<compile_context>
chip_gen: v7x
topology: tpu7x:2x2x1
jax: 0.10.0
libtpu: 0.0.40
codegen_flags: <defaults>
</compile_context>

<pallas_src>
import re

import jax
import jax.numpy as jnp
from jax.experimental import pallas as pl
from jax.experimental.pallas import tpu as pltpu


def sae_kernel(x_ref, we_ref, be_ref, wd_ref, bd_ref, xr_ref, h_ref, acc_ref):
    j = pl.program_id(1)

    @pl.when(j == 0)
    def _():
        acc_ref[...] = jnp.zeros_like(acc_ref)

    # Encoder tile: h_j = sigmoid(x @ We[:, j] + be[j]); f32 MXU accumulation.
    h = jax.nn.sigmoid(
        jnp.dot(x_ref[...], we_ref[...], preferred_element_type=jnp.float32)
        + be_ref[...].astype(jnp.float32)
    )
    # Single f32 -> storage-dtype cast, reused for the store and the decoder operand.
    h_lo = h.astype(h_ref.dtype)
    h_ref[...] = h_lo

    # Decoder partial sum: acc += h_j @ Wd[j, :]  (bf16 MXU path, f32 accumulate).
    acc_ref[...] += jnp.dot(
        h_lo.astype(wd_ref.dtype), wd_ref[...], preferred_element_type=jnp.float32
    )

    @pl.when(j == pl.num_programs(1) - 1)
    def _():
        xr_ref[...] = jax.nn.sigmoid(
            acc_ref[...] + bd_ref[...].astype(jnp.float32)
        ).astype(xr_ref.dtype)


def _round_up(x, m):
    return (x + m - 1) // m * m


def _tpu_generation():
    try:
        kind = jax.devices()[0].device_kind
    except Exception:
        return 6
    m = re.search(r"(\d+)", kind)
    return int(m.group(1)) if m else 6


def _vmem_cap_bytes(gen):
    # Leave headroom below physical VMEM for compiler scratch / DMA descriptors.
    if gen >= 7:
        return 48 << 20      # v7x: 64 MiB physical per TC
    if gen in (5, 6):
        return 104 << 20     # v5e / v6e: 128 MiB physical
    return 48 << 20          # unknown / older: conservative


def _feature_pad(d, gen):
    # v6e/v7x MXU is 2x256^2: a K/N dim that is an odd multiple of 128 (>128)
    # half-fills the systolic array. v5e's 4x128^2 is fully fed at 128.
    g = 256 if (gen >= 6 and d > 128) else 128
    return _round_up(d, g)


def _choose_batch_tile(B, gen, tb_max):
    sub = 16                        # sublane alignment covering bf16 & f32
    num_tcs = 2 if gen >= 7 else 1
    if num_tcs > 1:
        # v7x: keep >= 2 batch grid steps so both TensorCores get work.
        tb = min(tb_max, _round_up(-(-B // num_tcs), sub))
    else:
        # single-TC chips: minimize grid steps (per-step overhead dominates small).
        tb = min(tb_max, _round_up(B, sub))
    tb = max(tb, sub)
    return tb, _round_up(B, tb)


def _hidden_tile_candidates(d_hid_p):
    m = d_hid_p // 128
    return [128 * d for d in range(m, 0, -1) if m % d == 0]  # descending, divide D_hid_p


def _vmem_footprint(tb, th, d_in_p, nj, isz):
    wbuf = 1 if nj == 1 else 2      # weight tiles double-buffered only when streamed
    x_b = 2 * tb * d_in_p * isz
    we_b = wbuf * d_in_p * th * isz
    be_b = wbuf * 8 * th * isz
    wd_b = wbuf * th * d_in_p * isz
    bd_b = 8 * d_in_p * isz
    xr_b = 2 * tb * d_in_p * isz
    h_b = 2 * tb * th * isz
    acc_b = tb * d_in_p * 4
    tmp_b = tb * (th + d_in_p) * 4  # f32 intermediates
    return x_b + we_b + be_b + wd_b + bd_b + xr_b + h_b + acc_b + tmp_b


def sparse_autoencoder_forward(x, w_enc, b_enc, w_dec, b_dec, *,
                               max_batch_tile=512, max_hidden_tile=None):
    B, D_in = x.shape
    D_hid = w_enc.shape[1]
    gen = _tpu_generation()
    isz = x.dtype.itemsize

    D_in_p = _feature_pad(D_in, gen)
    D_hid_p = _feature_pad(D_hid, gen)
    tb, B_p = _choose_batch_tile(B, gen, max_batch_tile)

    # Pick the largest hidden tile that keeps the footprint inside the budget.
    vmem_cap = _vmem_cap_bytes(gen)
    budget = int(0.85 * vmem_cap)
    cands = _hidden_tile_candidates(D_hid_p)
    if max_hidden_tile is not None:
        filt = [c for c in cands if c <= max_hidden_tile]
        cands = filt if filt else [cands[-1]]
    th = cands[-1]
    for c in cands:
        if _vmem_footprint(tb, c, D_in_p, D_hid_p // c, isz) <= budget:
            th = c
            break

    nb, nj = B_p // tb, D_hid_p // th
    grid = (nb, nj)

    padded = (B_p, D_in_p, D_hid_p) != (B, D_in, D_hid)
    if padded:
        x = jnp.pad(x, ((0, B_p - B), (0, D_in_p - D_in)))
        w_enc = jnp.pad(w_enc, ((0, D_in_p - D_in), (0, D_hid_p - D_hid)))
        b_enc = jnp.pad(b_enc, ((0, 0), (0, D_hid_p - D_hid)))
        w_dec = jnp.pad(w_dec, ((0, D_hid_p - D_hid), (0, D_in_p - D_in)))
        b_dec = jnp.pad(b_dec, ((0, 0), (0, D_in_p - D_in)))
    # NOTE: padded hidden lanes carry sigmoid(0)=0.5 inside the kernel; W_dec's
    # padded rows are zero so x_recon is unaffected, and h is sliced back below.
    # Any future in-kernel reduction over h (e.g. L1/KL sparsity) must mask them.

    footprint = _vmem_footprint(tb, th, D_in_p, nj, isz)
    vmem_limit = int(min(vmem_cap, max(32 << 20, int(1.25 * footprint) + (4 << 20))))

    w_bytes = sum(a.size * a.dtype.itemsize for a in (w_enc, b_enc, w_dec, b_dec))
    cost = pl.CostEstimate(
        flops=4 * B_p * D_in_p * D_hid_p,            # two matmuls
        transcendentals=B_p * (D_in_p + D_hid_p),    # two sigmoids
        bytes_accessed=(x.size * isz
                        + (nb if nj > 1 else 1) * w_bytes
                        + B_p * (D_in_p + D_hid_p) * isz),
    )

    # Mandatory single-buffering for grid-invariant blocks (no silent fallback).
    single = pl.Buffered(1)

    if nj == 1:
        # Weight-resident fast path: all weight blocks are grid-invariant.
        we_spec = pl.BlockSpec((D_in_p, th), lambda i, j: (0, 0), pipeline_mode=single)
        be_spec = pl.BlockSpec((1, th), lambda i, j: (0, 0), pipeline_mode=single)
        wd_spec = pl.BlockSpec((th, D_in_p), lambda i, j: (0, 0), pipeline_mode=single)
    else:
        # Streamed hidden tiles: default double-buffering overlaps the DMA of
        # weight tile j+1 with the compute of tile j.
        we_spec = pl.BlockSpec((D_in_p, th), lambda i, j: (0, j))
        be_spec = pl.BlockSpec((1, th), lambda i, j: (0, j))
        wd_spec = pl.BlockSpec((th, D_in_p), lambda i, j: (j, 0))
    bd_spec = pl.BlockSpec((1, D_in_p), lambda i, j: (0, 0), pipeline_mode=single)

    x_recon, h = pl.pallas_call(
        sae_kernel,
        out_shape=(
            jax.ShapeDtypeStruct((B_p, D_in_p), x.dtype),
            jax.ShapeDtypeStruct((B_p, D_hid_p), x.dtype),
        ),
        grid_spec=pltpu.PrefetchScalarGridSpec(
            num_scalar_prefetch=0,
            grid=grid,
            in_specs=[
                pl.BlockSpec((tb, D_in_p), lambda i, j: (i, 0)),
                we_spec,
                be_spec,
                wd_spec,
                bd_spec,
            ],
            out_specs=[
                pl.BlockSpec((tb, D_in_p), lambda i, j: (i, 0)),   # resident across j
                pl.BlockSpec((tb, th), lambda i, j: (i, j)),
            ],
            scratch_shapes=[pltpu.VMEM((tb, D_in_p), jnp.float32)],
        ),
        compiler_params=pltpu.CompilerParams(
            dimension_semantics=("parallel", "arbitrary"),
            vmem_limit_bytes=vmem_limit,
        ),
        cost_estimate=cost,
    )(x, w_enc, b_enc, w_dec, b_dec)

    if padded:
        x_recon = x_recon[:B, :D_in]
        h = h[:B, :D_hid]
    return x_recon, h


def init_params(key, input_dim, output_dim, dtype=jnp.float32):
    # Deterministic init mimicking torch.nn.Linear's uniform(-1/sqrt(fan_in), ...).
    k1, k2, k3, k4 = jax.random.split(key, 4)
    lim_e = 1.0 / jnp.sqrt(input_dim)
    lim_d = 1.0 / jnp.sqrt(output_dim)
    # Stored transposed for matmul: [in, out].
    w_enc = jax.random.uniform(k1, (input_dim, output_dim), jnp.float32, -lim_e, lim_e)
    b_enc = jax.random.uniform(k2, (1, output_dim), jnp.float32, -lim_e, lim_e)
    w_dec = jax.random.uniform(k3, (output_dim, input_dim), jnp.float32, -lim_d, lim_d)
    b_dec = jax.random.uniform(k4, (1, input_dim), jnp.float32, -lim_d, lim_d)
    return (w_enc.astype(dtype), b_enc.astype(dtype),
            w_dec.astype(dtype), b_dec.astype(dtype))


if __name__ == "__main__":
    key = jax.random.PRNGKey(0)
    B, input_dim, output_dim = 256, 256, 256
    dtype = jnp.bfloat16
    kx, kp = jax.random.split(key)
    x = jax.random.normal(kx, (B, input_dim), jnp.float32).astype(dtype)
    w_enc, b_enc, w_dec, b_dec = init_params(kp, input_dim, output_dim, dtype=dtype)

    # Pure-JAX reference (f32 math on the same bf16-stored values).
    xf = x.astype(jnp.float32)
    we, be = w_enc.astype(jnp.float32), b_enc.astype(jnp.float32)
    wd, bd = w_dec.astype(jnp.float32), b_dec.astype(jnp.float32)
    h_ref = jax.nn.sigmoid(xf @ we + be)
    xr_ref = jax.nn.sigmoid(h_ref.astype(dtype).astype(jnp.float32) @ wd + bd)

    # Path 1: default (weight-resident, single hidden tile).
    fwd = jax.jit(sparse_autoencoder_forward)
    xr1, h1 = fwd(x, w_enc, b_enc, w_dec, b_dec)
    jax.block_until_ready((xr1, h1))

    # Path 2: force hidden-dim tiling (f32 decoder accumulator / scaling path).
    fwd_tiled = jax.jit(
        lambda *a: sparse_autoencoder_forward(*a, max_hidden_tile=128)
    )
    xr2, h2 = fwd_tiled(x, w_enc, b_enc, w_dec, b_dec)
    jax.block_until_ready((xr2, h2))

    for name, xr_k, h_k in (("resident", xr1, h1), ("tiled", xr2, h2)):
        assert jnp.allclose(h_k.astype(jnp.float32), h_ref, atol=1e-2), \
            f"hidden mismatch ({name})"
        assert jnp.allclose(xr_k.astype(jnp.float32), xr_ref, atol=1e-2), \
            f"recon mismatch ({name})"

    print("KERNEL_OK")
</pallas_src>

<mosaic_0001>
module attributes {stable_mosaic.version = 11 : i64} {
  func.func @sae_kernel(%arg0: i32, %arg1: i32, %arg2: memref<256x256xbf16, #tpu.memory_space<vmem>>, %arg3: memref<256x256xbf16, #tpu.memory_space<vmem>>, %arg4: memref<1x256xbf16, #tpu.memory_space<vmem>>, %arg5: memref<256x256xbf16, #tpu.memory_space<vmem>>, %arg6: memref<1x256xbf16, #tpu.memory_space<vmem>>, %arg7: memref<256x256xbf16, #tpu.memory_space<vmem>>, %arg8: memref<256x256xbf16, #tpu.memory_space<vmem>>, %arg9: memref<256x256xf32, #tpu.memory_space<vmem>>) attributes {dimension_semantics = [#tpu.dimension_semantics<parallel>, #tpu.dimension_semantics<arbitrary>], iteration_bounds = array<i64: 1, 1>, scalar_prefetch = 0 : i64, scratch_operands = 1 : i64, tpu.core_type = #tpu.core_type<tc>, window_params = [{transform_indices = @transform_0, window_bounds = array<i64: 256, 256>}, {pipeline_mode = #tpu.pipeline_mode<synchronous>, transform_indices = @transform_1, window_bounds = array<i64: 256, 256>}, {pipeline_mode = #tpu.pipeline_mode<synchronous>, transform_indices = @transform_2, window_bounds = array<i64: 1, 256>}, {pipeline_mode = #tpu.pipeline_mode<synchronous>, transform_indices = @transform_3, window_bounds = array<i64: 256, 256>}, {pipeline_mode = #tpu.pipeline_mode<synchronous>, transform_indices = @transform_4, window_bounds = array<i64: 1, 256>}, {transform_indices = @transform_5, window_bounds = array<i64: 256, 256>}, {transform_indices = @transform_6, window_bounds = array<i64: 256, 256>}]} {
    %c0_i32 = arith.constant 0 : i32
    %0 = arith.cmpi eq, %arg1, %c0_i32 : i32
    %1 = arith.extui %0 : i1 to i32
    %c0_i32_0 = arith.constant 0 : i32
    %2 = arith.cmpi ne, %1, %c0_i32_0 : i32
    scf.if %2 {
      %cst_18 = arith.constant 0.000000e+00 : f32
      %25 = vector.broadcast %cst_18 : f32 to vector<256x256xf32>
      %c0_19 = arith.constant 0 : index
      %c0_20 = arith.constant 0 : index
      %26 = vector.load %arg9[%c0_19, %c0_20] : memref<256x256xf32, #tpu.memory_space<vmem>>, vector<256x256xf32>
      tpu.vector_store %arg9[%c0_19, %c0_20], %25 {strides = array<i32>} : memref<256x256xf32, #tpu.memory_space<vmem>>, vector<256x256xf32>,
    } else {
    }
    %c0 = arith.constant 0 : index
    %c0_1 = arith.constant 0 : index
    %3 = vector.load %arg2[%c0, %c0_1] : memref<256x256xbf16, #tpu.memory_space<vmem>>, vector<256x256xbf16>
    %c0_2 = arith.constant 0 : index
    %c0_3 = arith.constant 0 : index
    %4 = vector.load %arg3[%c0_2, %c0_3] : memref<256x256xbf16, #tpu.memory_space<vmem>>, vector<256x256xbf16>
    %cst = arith.constant dense<0.000000e+00> : vector<256x256xf32>
    %5 = tpu.matmul %3, %4, %cst {dimension_numbers = #tpu.dot_dimension_numbers<[1], [0], [0], [1], [0, 0, 1, 1], [], []>} : vector<256x256xbf16>, vector<256x256xbf16>, vector<256x256xf32> -> vector<256x256xf32>
    %c0_4 = arith.constant 0 : index
    %c0_5 = arith.constant 0 : index
    %6 = vector.load %arg4[%c0_4, %c0_5] : memref<1x256xbf16, #tpu.memory_space<vmem>>, vector<1x256xbf16>
    %7 = arith.extf %6 : vector<1x256xbf16> to vector<1x256xf32>
    %8 = vector.broadcast %7 : vector<1x256xf32> to vector<256x256xf32>
    %9 = arith.addf %5, %8 : vector<256x256xf32>
    %10 = arith.negf %9 : vector<256x256xf32>
    %11 = math.exp %10 : vector<256x256xf32>
    %cst_6 = arith.constant 1.000000e+00 : f32
    %12 = vector.broadcast %cst_6 : f32 to vector<256x256xf32>
    %13 = arith.addf %12, %11 : vector<256x256xf32>
    %14 = arith.divf %12, %13 : vector<256x256xf32>
    %15 = arith.truncf %14 : vector<256x256xf32> to vector<256x256xbf16>
    %c0_7 = arith.constant 0 : index
    %c0_8 = arith.constant 0 : index
    %16 = vector.load %arg8[%c0_7, %c0_8] : memref<256x256xbf16, #tpu.memory_space<vmem>>, vector<256x256xbf16>
    tpu.vector_store %arg8[%c0_7, %c0_8], %15 {strides = array<i32>} : memref<256x256xbf16, #tpu.memory_space<vmem>>, vector<256x256xbf16>,
    %c0_9 = arith.constant 0 : index
    %c0_10 = arith.constant 0 : index
    %17 = vector.load %arg9[%c0_9, %c0_10] : memref<256x256xf32, #tpu.memory_space<vmem>>, vector<256x256xf32>
    %c0_11 = arith.constant 0 : index
    %c0_12 = arith.constant 0 : index
    %18 = vector.load %arg5[%c0_11, %c0_12] : memref<256x256xbf16, #tpu.memory_space<vmem>>, vector<256x256xbf16>
    %cst_13 = arith.constant dense<0.000000e+00> : vector<256x256xf32>
    %19 = tpu.matmul %15, %18, %cst_13 {dimension_numbers = #tpu.dot_dimension_numbers<[1], [0], [0], [1], [0, 0, 1, 1], [], []>} : vector<256x256xbf16>, vector<256x256xbf16>, vector<256x256xf32> -> vector<256x256xf32>
    %20 = arith.addf %17, %19 : vector<256x256xf32>
    %c0_14 = arith.constant 0 : index
    %c0_15 = arith.constant 0 : index
    %21 = vector.load %arg9[%c0_14, %c0_15] : memref<256x256xf32, #tpu.memory_space<vmem>>, vector<256x256xf32>
    tpu.vector_store %arg9[%c0_14, %c0_15], %20 {strides = array<i32>} : memref<256x256xf32, #tpu.memory_space<vmem>>, vector<256x256xf32>,
    %c0_i32_16 = arith.constant 0 : i32
    %22 = arith.cmpi eq, %arg1, %c0_i32_16 : i32
    %23 = arith.extui %22 : i1 to i32
    %c0_i32_17 = arith.constant 0 : i32
    %24 = arith.cmpi ne, %23, %c0_i32_17 : i32
    scf.if %24 {
      %c0_18 = arith.constant 0 : index
      %c0_19 = arith.constant 0 : index
      %25 = vector.load %arg9[%c0_18, %c0_19] : memref<256x256xf32, #tpu.memory_space<vmem>>, vector<256x256xf32>
      %c0_20 = arith.constant 0 : index
      %c0_21 = arith.constant 0 : index
      %26 = vector.load %arg6[%c0_20, %c0_21] : memref<1x256xbf16, #tpu.memory_space<vmem>>, vector<1x256xbf16>
      %27 = arith.extf %26 : vector<1x256xbf16> to vector<1x256xf32>
      %28 = vector.broadcast %27 : vector<1x256xf32> to vector<256x256xf32>
      %29 = arith.addf %25, %28 : vector<256x256xf32>
      %30 = arith.negf %29 : vector<256x256xf32>
      %31 = math.exp %30 : vector<256x256xf32>
      %cst_22 = arith.constant 1.000000e+00 : f32
      %32 = vector.broadcast %cst_22 : f32 to vector<256x256xf32>
      %33 = arith.addf %32, %31 : vector<256x256xf32>
      %34 = arith.divf %32, %33 : vector<256x256xf32>
      %35 = arith.truncf %34 : vector<256x256xf32> to vector<256x256xbf16>
      %c0_23 = arith.constant 0 : index
      %c0_24 = arith.constant 0 : index
      %36 = vector.load %arg7[%c0_23, %c0_24] : memref<256x256xbf16, #tpu.memory_space<vmem>>, vector<256x256xbf16>
      tpu.vector_store %arg7[%c0_23, %c0_24], %35 {strides = array<i32>} : memref<256x256xbf16, #tpu.memory_space<vmem>>, vector<256x256xbf16>,
    } else {
    }
    return
  }
  func.func @transform_0(%arg0: i32, %arg1: i32) -> (i32, i32) {
    %c0_i32 = arith.constant 0 : i32
    %c0_i32_0 = arith.constant 0 : i32
    return %arg0, %c0_i32 : i32, i32
  }
  func.func @transform_1(%arg0: i32, %arg1: i32) -> (i32, i32) {
    %c0_i32 = arith.constant 0 : i32
    %c0_i32_0 = arith.constant 0 : i32
    %c0_i32_1 = arith.constant 0 : i32
    return %c0_i32, %c0_i32_0 : i32, i32
  }
  func.func @transform_2(%arg0: i32, %arg1: i32) -> (i32, i32) {
    %c0_i32 = arith.constant 0 : i32
    %c0_i32_0 = arith.constant 0 : i32
    %c0_i32_1 = arith.constant 0 : i32
    return %c0_i32, %c0_i32_0 : i32, i32
  }
  func.func @transform_3(%arg0: i32, %arg1: i32) -> (i32, i32) {
    %c0_i32 = arith.constant 0 : i32
    %c0_i32_0 = arith.constant 0 : i32
    %c0_i32_1 = arith.constant 0 : i32
    return %c0_i32, %c0_i32_0 : i32, i32
  }
  func.func @transform_4(%arg0: i32, %arg1: i32) -> (i32, i32) {
    %c0_i32 = arith.constant 0 : i32
    %c0_i32_0 = arith.constant 0 : i32
    %c0_i32_1 = arith.constant 0 : i32
    return %c0_i32, %c0_i32_0 : i32, i32
  }
  func.func @transform_5(%arg0: i32, %arg1: i32) -> (i32, i32) {
    %c0_i32 = arith.constant 0 : i32
    %c0_i32_0 = arith.constant 0 : i32
    return %arg0, %c0_i32 : i32, i32
  }
  func.func @transform_6(%arg0: i32, %arg1: i32) -> (i32, i32) {
    %c0_i32 = arith.constant 0 : i32
    return %arg0, %arg1 : i32, i32
  }
}

</mosaic_0001>

<bundles_post_ra>
// kernel: sparse_autoencoder_forward.1
= control target key start
LH: loop header
LB: loop body
LE: loop exit
PB: predicated region body
PF: predicated region fallthrough
CT: control target
= control target key end

     0   :  { %12 = vsyncpa [#allocation4], 0  ;;  %s4125_s0 = inlined_call_operand.hbm [shape: bf16[256,256], index: 0, kind: input, shape index: {}]   ;;  %s4126_s1 = inlined_call_operand.hbm [shape: bf16[256,256], index: 1, kind: input, shape index: {}]   ;;  %s4127_s2 = inlined_call_operand.vmem [shape: bf16[1,256], index: 2, kind: input, shape index: {}]   ;;  %s4128_s3 = inlined_call_operand.hbm [shape: bf16[256,256], index: 3, kind: input, shape index: {}]   ;;  %s4129_s4 = inlined_call_operand.vmem [shape: bf16[1,256], index: 4, kind: input, shape index: {}]   ;;  %s4130_s5 = inlined_call_operand.hbm [shape: bf16[256,256], index: 5, kind: output, shape index: {0}]   ;;  %s4131_s6 = inlined_call_operand.hbm [shape: bf16[256,256], index: 6, kind: output, shape index: {1}]  }
   0x1   :  { %13 = vsyncpa [#allocation7], 0 }
   0x2   :  { %14 = vsyncpa [#allocation5], 0 }
   0x3   :  { %15 = vsyncpa [#allocation11], 0  ;;  %s3843_s21 = smov [#allocation6]   ;;  %s3844_s23 = smov [#allocation3]  }
   0x4   :  { %s33_s22 = sshll.u32 %s3843_s21, 4  ;;  %s21_s24 = sshll.u32 %s3844_s23, 4  ;;  %s34_s22 = int_to_ptr.vmem [resolvable:$true] %s33_s22  ;;  %s3885_s24 = int_to_ptr.vmem [resolvable:$true] %s21_s24 }
   0x5   :  { %s3725_s27 = scalar_lea.hbm %s4126_s1, 4096 }
   0x6   :  { %p3726_p0 = scmp.ne.s32.totalorder %s4126_s1, %s3725_s27  ;;  %p3729_p1 = scmp.lt.u32.totalorder %s3725_s27, %s4126_s1 }
   0x8   :  { %p3731_p2 = pnand %p3729_p1, %p3726_p0 }
   0xa   :  { %3734 = shalt.err (!%p3731_p2)
}
   0xb   :  { %s3735_s8 = scalar_lea.vmem %s34_s22, 4096  ;;  %p3740_p4 = scmp.lt.s32.totalorder %s34_s22, %s34_s22 }
   0xc   :  { %p3736_p3 = scmp.ne.s32.totalorder %s34_s22, %s3735_s8  ;;  %p3741_p5 = scmp.lt.s32.totalorder %s3735_s8, %s3735_s8 }
   0xe   :  { %p3742_p6 = por %p3741_p5, %p3740_p4 }
  0x10   :  { %p3743_p7 = pnand %p3742_p6, %p3736_p3 }
  0x12   :  { %3746 = shalt.err (!%p3743_p7)
}
  0x13   :  { %s3845_s9 = smov 128   ;;  %s3846_s10 = smov 8  }
  0x14   :  { %39 = dma.hbm_to_vmem [thread:$0]  %s4126_s1, 4096, %s34_s22, [#allocation7], %s3845_s9, %s3845_s9, %s3846_s10  }
  0x15   :  { %s3747_s15 = scalar_lea.hbm %s4125_s0, 4096 }
  0x16   :  { %p3748_p8 = scmp.ne.s32.totalorder %s4125_s0, %s3747_s15  ;;  %p3751_p9 = scmp.lt.u32.totalorder %s3747_s15, %s4125_s0 }
  0x18   :  { %p3753_p10 = pnand %p3751_p9, %p3748_p8 }
  0x1a   :  { %3756 = shalt.err (!%p3753_p10)
}
  0x1b   :  { %s3757_s20 = scalar_lea.vmem %s3885_s24, 4096  ;;  %p3762_p12 = scmp.lt.s32.totalorder %s3885_s24, %s3885_s24 }
  0x1c   :  { %p3758_p11 = scmp.ne.s32.totalorder %s3885_s24, %s3757_s20  ;;  %p3763_p13 = scmp.lt.s32.totalorder %s3757_s20, %s3757_s20 }
  0x1e   :  { %p3764_p0 = por %p3763_p13, %p3762_p12 }
  0x20   :  { %p3765_p1 = pnand %p3764_p0, %p3758_p11 }
  0x22   :  { %3768 = shalt.err (!%p3765_p1)
}
  0x23   :  { %27 = dma.hbm_to_vmem [thread:$0]  %s4125_s0, 4096, %s3885_s24, [#allocation4], %s3845_s9, %s3845_s9, %s3846_s10  }
  0x24   :  { %s3847_s22 = smov [#allocation8]   ;;  %s3769_s27 = scalar_lea.hbm %s4128_s3, 4096 }
  0x25   :  { %s47_s23 = sshll.u32 %s3847_s22, 4  ;;  %p3770_p2 = scmp.ne.s32.totalorder %s4128_s3, %s3769_s27  ;;  %s48_s23 = int_to_ptr.vmem [resolvable:$true] %s47_s23 }
  0x26   :  { %p3773_p3 = scmp.lt.u32.totalorder %s3769_s27, %s4128_s3 }
  0x28   :  { %p3775_p4 = pnand %p3773_p3, %p3770_p2 }
  0x2a   :  { %3778 = shalt.err (!%p3775_p4)
}
  0x2b   :  { %s3779_s8 = scalar_lea.vmem %s48_s23, 4096  ;;  %p3784_p6 = scmp.lt.s32.totalorder %s48_s23, %s48_s23 }
  0x2c   :  { %p3780_p5 = scmp.ne.s32.totalorder %s48_s23, %s3779_s8  ;;  %p3785_p7 = scmp.lt.s32.totalorder %s3779_s8, %s3779_s8 }
  0x2e   :  { %p3786_p8 = por %p3785_p7, %p3784_p6 }
  0x30   :  { %p3787_p9 = pnand %p3786_p8, %p3780_p5 }
  0x32   :  { %3790 = shalt.err (!%p3787_p9)
}
  0x33   :  { %53 = dma.hbm_to_vmem [thread:$0]  %s4128_s3, 4096, %s48_s23, [#allocation7], %s3845_s9, %s3845_s9, %s3846_s10  }
  0x34   :  { %3835 = dma.done.wait [#allocation4], 4096  }
  0x35   :  { %3836 = vsyncadd [#allocation4], 4294963200 }
  0x36   :  { %3837 = dma.done.wait [#allocation7], 8192  }
  0x37   :  { %3838 = vsyncadd [#allocation7], 4294959104  ;;  %v3069_v0 = vld [vmem:[#allocation6 + $0x4] ss:$8 sps:$4 sm:$0xff]   ;;  %v3071_v1 = vld [vmem:[#allocation6] ss:$8 sps:$4 sm:$0xff]  }
  0x38   :  { %538 = vmatprep.subr.bf16.mxu0 %v3069_v0  ;;  %v3072_v2 = vld [vmem:[#allocation6 + $0x14] ss:$8 sps:$4 sm:$0xff]   ;;  %v3074_v3 = vld [vmem:[#allocation6 + $0x10] ss:$8 sps:$4 sm:$0xff]   ;;  %v3075_v4 = vld [vmem:[#allocation6 + $0x24] ss:$8 sps:$4 sm:$0xff]  }
  0x39   :  { %539 = vmatpush1.bf16.msra.mxu0 %v3071_v1  ;;  %v3077_v5 = vld [vmem:[#allocation6 + $0x20] ss:$8 sps:$4 sm:$0xff]   ;;  %v3078_v6 = vld [vmem:[#allocation6 + $0x34] ss:$8 sps:$4 sm:$0xff]   ;;  %v3080_v7 = vld [vmem:[#allocation6 + $0x30] ss:$8 sps:$4 sm:$0xff]  }
  0x3a   :  { %540 = vmatprep.subr.bf16.mxu0 %v3072_v2  ;;  %v3081_v8 = vld [vmem:[#allocation6 + $0x44] ss:$8 sps:$4 sm:$0xff]   ;;  %v3083_v9 = vld [vmem:[#allocation6 + $0x40] ss:$8 sps:$4 sm:$0xff]   ;;  %v3084_v10 = vld [vmem:[#allocation6 + $0x54] ss:$8 sps:$4 sm:$0xff]  }
  0x3b   :  { %v3086_v11 = vld [vmem:[#allocation6 + $0x50] ss:$8 sps:$4 sm:$0xff]   ;;  %v3087_v12 = vld [vmem:[#allocation6 + $0x64] ss:$8 sps:$4 sm:$0xff]   ;;  %v3089_v14 = vld [vmem:[#allocation6 + $0x60] ss:$8 sps:$4 sm:$0xff]  }
  0x3c   :  { %v3119_v13 = vld [vmem:[#allocation3 + $0x4] ss:$8 sps:$4 sm:$0xff]   ;;  %v3090_v15 = vld [vmem:[#allocation6 + $0x74] ss:$8 sps:$4 sm:$0xff]   ;;  %v3092_v16 = vld [vmem:[#allocation6 + $0x70] ss:$8 sps:$4 sm:$0xff]  }
  0x3d   :  { %541 = vmatpush1.bf16.msra.mxu0 %v3074_v3  ;;  %570 = vmatprep.mubr.bf16.mxu0 %v3119_v13  ;;  %v3093_v17 = vld [vmem:[#allocation6 + $0x84] ss:$8 sps:$4 sm:$0xff]   ;;  %v3095_v18 = vld [vmem:[#allocation6 + $0x80] ss:$8 sps:$4 sm:$0xff]   ;;  %v3096_v19 = vld [vmem:[#allocation6 + $0x94] ss:$8 sps:$4 sm:$0xff]  }
  0x3e   :  { %542 = vmatprep.subr.bf16.mxu0 %v3075_v4  ;;  %v3098_v20 = vld [vmem:[#allocation6 + $0x90] ss:$8 sps:$4 sm:$0xff]   ;;  %v3099_v21 = vld [vmem:[#allocation6 + $0xa4] ss:$8 sps:$4 sm:$0xff]   ;;  %v3101_v22 = vld [vmem:[#allocation6 + $0xa0] ss:$8 sps:$4 sm:$0xff]  }
  0x3f   :  { %v3102_v23 = vld [vmem:[#allocation6 + $0xb4] ss:$8 sps:$4 sm:$0xff]   ;;  %v3104_v24 = vld [vmem:[#allocation6 + $0xb0] ss:$8 sps:$4 sm:$0xff]   ;;  %v3105_v25 = vld [vmem:[#allocation6 + $0xc4] ss:$8 sps:$4 sm:$0xff]  }
  0x40   :  { %v3107_v26 = vld [vmem:[#allocation6 + $0xc0] ss:$8 sps:$4 sm:$0xff]   ;;  %v3108_v27 = vld [vmem:[#allocation6 + $0xd4] ss:$8 sps:$4 sm:$0xff]   ;;  %v3110_v28 = vld [vmem:[#allocation6 + $0xd0] ss:$8 sps:$4 sm:$0xff]  }
  0x41   :  { %543 = vmatpush1.bf16.msra.mxu0 %v3077_v5  ;;  %v3111_v29 = vld [vmem:[#allocation6 + $0xe4] ss:$8 sps:$4 sm:$0xff]   ;;  %v3113_v30 = vld [vmem:[#allocation6 + $0xe0] ss:$8 sps:$4 sm:$0xff]   ;;  %v3114_v31 = vld [vmem:[#allocation6 + $0xf4] ss:$8 sps:$4 sm:$0xff]  }
  0x42   :  { %544 = vmatprep.subr.bf16.mxu0 %v3078_v6  ;;  %v3165_v32 = vld [vmem:[#allocation8 + $0x4] ss:$8 sps:$4 sm:$0xff]   ;;  %v3167_v33 = vld [vmem:[#allocation8] ss:$8 sps:$4 sm:$0xff]   ;;  %v3168_v34 = vld [vmem:[#allocation8 + $0x14] ss:$8 sps:$4 sm:$0xff]  }
  0x43   :  { %v3116_v35 = vld [vmem:[#allocation6 + $0xf0] ss:$8 sps:$4 sm:$0xff]   ;;  %1595 = vmatprep.subr.bf16.mxu1 %v3165_v32  ;;  %v3117_v37 = vld [vmem:[#allocation3] ss:$8 sps:$4 sm:$0xff]   ;;  %v3171_v38 = vld [vmem:[#allocation8 + $0x24] ss:$8 sps:$4 sm:$0xff]   ;;  %v200_v32 = vlaneseq }
  0x44   :  { %1596 = vmatpush1.bf16.msra.mxu1 %v3167_v33  ;;  %v3170_v36 = vld [vmem:[#allocation8 + $0x10] ss:$8 sps:$4 sm:$0xff]   ;;  %v3120_v39 = vld [vmem:[#allocation3 + $0x14] ss:$8 sps:$4 sm:$0xff]   ;;  %v3173_v40 = vld [vmem:[#allocation8 + $0x20] ss:$8 sps:$4 sm:$0xff]  }
  0x45   :  { %545 = vmatpush1.bf16.msra.mxu0 %v3080_v7  ;;  %1597 = vmatprep.subr.bf16.mxu1 %v3168_v34  ;;  %v3174_v41 = vld [vmem:[#allocation8 + $0x34] ss:$8 sps:$4 sm:$0xff]   ;;  %v3176_v42 = vld [vmem:[#allocation8 + $0x30] ss:$8 sps:$4 sm:$0xff]   ;;  %v3177_v44 = vld [vmem:[#allocation8 + $0x44] ss:$8 sps:$4 sm:$0xff]  }
  0x46   :  { %546 = vmatprep.subr.bf16.mxu0 %v3081_v8  ;;  %v3122_v43 = vld [vmem:[#allocation3 + $0x10] ss:$8 sps:$4 sm:$0xff]   ;;  %v3123_v45 = vld [vmem:[#allocation3 + $0x24] ss:$8 sps:$4 sm:$0xff]   ;;  %v3179_v46 = vld [vmem:[#allocation8 + $0x40] ss:$8 sps:$4 sm:$0xff]  }
  0x47   :  { %v3180_v47 = vld [vmem:[#allocation8 + $0x54] ss:$8 sps:$4 sm:$0xff]   ;;  %v3182_v48 = vld [vmem:[#allocation8 + $0x50] ss:$8 sps:$4 sm:$0xff]   ;;  %v3125_v49 = vld [vmem:[#allocation3 + $0x20] ss:$8 sps:$4 sm:$0xff]  }
  0x48   :  { %1598 = vmatpush1.bf16.msra.mxu1 %v3170_v36  ;;  %v3183_v50 = vld [vmem:[#allocation8 + $0x64] ss:$8 sps:$4 sm:$0xff]   ;;  %v3126_v51 = vld [vmem:[#allocation3 + $0x34] ss:$8 sps:$4 sm:$0xff]   ;;  %v3185_v52 = vld [vmem:[#allocation8 + $0x60] ss:$8 sps:$4 sm:$0xff]  }
  0x49   :  { %547 = vmatpush1.bf16.msra.mxu0 %v3083_v9  ;;  %1599 = vmatprep.subr.bf16.mxu1 %v3171_v38  ;;  %v3186_v53 = vld [vmem:[#allocation8 + $0x74] ss:$8 sps:$4 sm:$0xff]   ;;  %v3128_v54 = vld [vmem:[#allocation3 + $0x30] ss:$8 sps:$4 sm:$0xff]   ;;  %v3129_v55 = vld [vmem:[#allocation3 + $0x44] ss:$8 sps:$4 sm:$0xff]  }
  0x4a   :  { %548 = vmatprep.subr.bf16.mxu0 %v3084_v10  ;;  %v3131_v56 = vld [vmem:[#allocation3 + $0x40] ss:$8 sps:$4 sm:$0xff]   ;;  %v3132_v57 = vld [vmem:[#allocation3 + $0x54] ss:$8 sps:$4 sm:$0xff]   ;;  %v3134_v58 = vld [vmem:[#allocation3 + $0x50] ss:$8 sps:$4 sm:$0xff]  }
  0x4b   :  { %v3135_v59 = vld [vmem:[#allocation3 + $0x64] ss:$8 sps:$4 sm:$0xff]   ;;  %v3137_v60 = vld [vmem:[#allocation3 + $0x60] ss:$8 sps:$4 sm:$0xff]   ;;  %v3138_v61 = vld [vmem:[#allocation3 + $0x74] ss:$8 sps:$4 sm:$0xff]  }
  0x4c   :  { %1600 = vmatpush1.bf16.msra.mxu1 %v3173_v40  ;;  %v3140_v62 = vld [vmem:[#allocation3 + $0x70] ss:$8 sps:$4 sm:$0xff]   ;;  %v3141_v63 = vld [vmem:[#allocation3 + $0x84] ss:$8 sps:$4 sm:$0xff]   ;;  %v3143_v0 = vld [vmem:[#allocation3 + $0x80] ss:$8 sps:$4 sm:$0xff]  }
  0x4d   :  { %549 = vmatpush1.bf16.msra.mxu0 %v3086_v11  ;;  %1601 = vmatprep.subr.bf16.mxu1 %v3174_v41  ;;  %v3144_v1 = vld [vmem:[#allocation3 + $0x94] ss:$8 sps:$4 sm:$0xff]   ;;  %v3146_v2 = vld [vmem:[#allocation3 + $0x90] ss:$8 sps:$4 sm:$0xff]   ;;  %v3147_v3 = vld [vmem:[#allocation3 + $0xa4] ss:$8 sps:$4 sm:$0xff]  }
  0x4e   :  { %550 = vmatprep.subr.bf16.mxu0 %v3087_v12  ;;  %v3149_v4 = vld [vmem:[#allocation3 + $0xa0] ss:$8 sps:$4 sm:$0xff]   ;;  %v3150_v5 = vld [vmem:[#allocation3 + $0xb4] ss:$8 sps:$4 sm:$0xff]   ;;  %v3188_v6 = vld [vmem:[#allocation8 + $0x70] ss:$8 sps:$4 sm:$0xff]  }
  0x4f   :  { %v3152_v7 = vld [vmem:[#allocation3 + $0xb0] ss:$8 sps:$4 sm:$0xff]   ;;  %v3189_v8 = vld [vmem:[#allocation8 + $0x84] ss:$8 sps:$4 sm:$0xff]   ;;  %v3191_v10 = vld [vmem:[#allocation8 + $0x80] ss:$8 sps:$4 sm:$0xff]  }
  0x50   :  { %1602 = vmatpush1.bf16.msra.mxu1 %v3176_v42  ;;  %v3153_v9 = vld [vmem:[#allocation3 + $0xc4] ss:$8 sps:$4 sm:$0xff]   ;;  %v3192_v11 = vld [vmem:[#allocation8 + $0x94] ss:$8 sps:$4 sm:$0xff]   ;;  %v3194_v12 = vld [vmem:[#allocation8 + $0x90] ss:$8 sps:$4 sm:$0xff]  }
  0x51   :  { %551 = vmatpush1.bf16.msra.mxu0 %v3089_v14  ;;  %1603 = vmatprep.subr.bf16.mxu1 %v3177_v44  ;;  %v3155_v13 = vld [vmem:[#allocation3 + $0xc0] ss:$8 sps:$4 sm:$0xff]   ;;  %v3195_v14 = vld [vmem:[#allocation8 + $0xa4] ss:$8 sps:$4 sm:$0xff]   ;;  %v3937_v33 = vshrl.u32 %v200_v32, 7 }
  0x52   :  { %552 = vmatprep.subr.bf16.mxu0 %v3090_v15  ;;  %v3156_v15 = vld [vmem:[#allocation3 + $0xd4] ss:$8 sps:$4 sm:$0xff]   ;;  %v197_v34 = vld [vmem:[%s4127_s2] sm:$0x3] }
  0x53   :  { %v3943_v36 = vsub.s32 0, %v3937_v33 }
  0x54   :  { %1604 = vmatpush1.bf16.msra.mxu1 %v3179_v46 }
  0x55   :  { %553 = vmatpush1.bf16.msra.mxu0 %v3092_v16  ;;  %1605 = vmatprep.subr.bf16.mxu1 %v3180_v47  ;;  %v3197_v16 = vld [vmem:[#allocation8 + $0xa0] ss:$8 sps:$4 sm:$0xff]  }
  0x56   :  { %554 = vmatprep.subr.bf16.mxu0 %v3093_v17  ;;  %v3198_v17 = vld [vmem:[#allocation8 + $0xb4] ss:$8 sps:$4 sm:$0xff]  }
  0x58   :  { %1606 = vmatpush1.bf16.msra.mxu1 %v3182_v48 }
  0x59   :  { %555 = vmatpush1.bf16.msra.mxu0 %v3095_v18  ;;  %1607 = vmatprep.subr.bf16.mxu1 %v3183_v50  ;;  %v3200_v18 = vld [vmem:[#allocation8 + $0xb0] ss:$8 sps:$4 sm:$0xff]  }
  0x5a   :  { %556 = vmatprep.subr.bf16.mxu0 %v3096_v19  ;;  %v3158_v19 = vld [vmem:[#allocation3 + $0xd0] ss:$8 sps:$4 sm:$0xff]  }
  0x5c   :  { %1608 = vmatpush1.bf16.msra.mxu1 %v3185_v52 }
  0x5d   :  { %557 = vmatpush1.bf16.msra.mxu0 %v3098_v20  ;;  %1609 = vmatprep.subr.bf16.mxu1 %v3186_v53  ;;  %v3159_v20 = vld [vmem:[#allocation3 + $0xe4] ss:$8 sps:$4 sm:$0xff]  }
  0x5e   :  { %558 = vmatprep.subr.bf16.mxu0 %v3099_v21  ;;  %v3201_v21 = vld [vmem:[#allocation8 + $0xc4] ss:$8 sps:$4 sm:$0xff]  }
  0x60   :  { %1610 = vmatpush1.bf16.msra.mxu1 %v3188_v6 }
  0x61   :  { %559 = vmatpush1.bf16.msra.mxu0 %v3101_v22  ;;  %1611 = vmatprep.subr.bf16.mxu1 %v3189_v8  ;;  %v3203_v22 = vld [vmem:[#allocation8 + $0xc0] ss:$8 sps:$4 sm:$0xff]  }
  0x62   :  { %560 = vmatprep.subr.bf16.mxu0 %v3102_v23  ;;  %v3204_v23 = vld [vmem:[#allocation8 + $0xd4] ss:$8 sps:$4 sm:$0xff]  }
  0x64   :  { %1612 = vmatpush1.bf16.msra.mxu1 %v3191_v10 }
  0x65   :  { %561 = vmatpush1.bf16.msra.mxu0 %v3104_v24  ;;  %1613 = vmatprep.subr.bf16.mxu1 %v3192_v11  ;;  %v3206_v24 = vld [vmem:[#allocation8 + $0xd0] ss:$8 sps:$4 sm:$0xff]  }
  0x66   :  { %562 = vmatprep.subr.bf16.mxu0 %v3105_v25  ;;  %v3161_v25 = vld [vmem:[#allocation3 + $0xe0] ss:$8 sps:$4 sm:$0xff]  }
  0x68   :  { %1614 = vmatpush1.bf16.msra.mxu1 %v3194_v12 }
  0x69   :  { %563 = vmatpush1.bf16.msra.mxu0 %v3107_v26  ;;  %1615 = vmatprep.subr.bf16.mxu1 %v3195_v14  ;;  %v3162_v26 = vld [vmem:[#allocation3 + $0xf4] ss:$8 sps:$4 sm:$0xff]  }
  0x6a   :  { %564 = vmatprep.subr.bf16.mxu0 %v3108_v27  ;;  %v3207_v27 = vld [vmem:[#allocation8 + $0xe4] ss:$8 sps:$4 sm:$0xff]  }
  0x6c   :  { %1616 = vmatpush1.bf16.msra.mxu1 %v3197_v16 }
  0x6d   :  { %565 = vmatpush1.bf16.msra.mxu0 %v3110_v28  ;;  %1617 = vmatprep.subr.bf16.mxu1 %v3198_v17  ;;  %v3209_v28 = vld [vmem:[#allocation8 + $0xe0] ss:$8 sps:$4 sm:$0xff]  }
  0x6e   :  { %566 = vmatprep.subr.bf16.mxu0 %v3111_v29  ;;  %v3210_v29 = vld [vmem:[#allocation8 + $0xf4] ss:$8 sps:$4 sm:$0xff]  }
  0x70   :  { %1618 = vmatpush1.bf16.msra.mxu1 %v3200_v18 }
  0x71   :  { %567 = vmatpush1.bf16.msra.mxu0 %v3113_v30  ;;  %1619 = vmatprep.subr.bf16.mxu1 %v3201_v21  ;;  %v3212_v30 = vld [vmem:[#allocation8 + $0xf0] ss:$8 sps:$4 sm:$0xff]  }
  0x72   :  { %568 = vmatprep.subr.bf16.mxu0 %v3114_v31  ;;  %v3164_v31 = vld [vmem:[#allocation3 + $0xf0] ss:$8 sps:$4 sm:$0xff]  }
  0x74   :  { %1620 = vmatpush1.bf16.msra.mxu1 %v3203_v22 }
  0x75   :  { %569 = vmatpush1.bf16.msra.mxu0 %v3116_v35  ;;  %1621 = vmatprep.subr.bf16.mxu1 %v3204_v23  ;;  %v198_v35 = vunpack.c.l.bf16 %v197_v34 }
  0x77   :  { %v203_v38 = vrot.slane %v198_v35, %v3943_v36 }
  0x78   :  { %571 = vmatmul.mubr.bf16.vlgmr.msra.gmra.mrb[0].mxu0 %v3117_v37  ;;  %1622 = vmatpush1.bf16.msra.mxu1 %v3206_v24  ;;  %v206_v37 = vsub.s32 2, %v3937_v33 }
  0x79   :  { %580 = vmatprep.mubr.bf16.mxu0 %v3120_v39  ;;  %1623 = vmatprep.subr.bf16.mxu1 %v3207_v27  ;;  %v3950_v40 = vrot.slane %v203_v38, %v3943_v36 }
  0x7a   :  { %v207_v39 = vrot.slane %v198_v35, %v206_v37 }
  0x7c   :  { %1624 = vmatpush1.bf16.msra.mxu1 %v3209_v28  ;;  %v3953_v41 = vrot.slane %v207_v39, %v3943_v36 }
  0x7d   :  { %1625 = vmatprep.subr.bf16.mxu1 %v3210_v29 }
  0x80   :  { %581 = vmatmul.mubr.bf16.gmra.mrb[4].mxu0 %v3122_v43  ;;  %1626 = vmatpush1.bf16.msra.mxu1 %v3212_v30 }
  0x81   :  { %590 = vmatprep.mubr.bf16.mxu0 %v3123_v45 }
  0x88   :  { %591 = vmatmul.mubr.bf16.gmra.mrb[8].mxu0 %v3125_v49 }
  0x89   :  { %600 = vmatprep.mubr.bf16.mxu0 %v3126_v51 }
  0x90   :  { %601 = vmatmul.mubr.bf16.gmra.mrb[12].mxu0 %v3128_v54 }
  0x91   :  { %610 = vmatprep.mubr.bf16.mxu0 %v3129_v55 }
  0x98   :  { %611 = vmatmul.mubr.bf16.gmra.mrb[16].mxu0 %v3131_v56 }
  0x99   :  { %620 = vmatprep.mubr.bf16.mxu0 %v3132_v57 }
  0xa0   :  { %621 = vmatmul.mubr.bf16.gmra.mrb[20].mxu0 %v3134_v58 }
  0xa1   :  { %630 = vmatprep.mubr.bf16.mxu0 %v3135_v59 }
  0xa8   :  { %631 = vmatmul.mubr.bf16.gmra.mrb[24].mxu0 %v3137_v60 }
  0xa9   :  { %640 = vmatprep.mubr.bf16.mxu0 %v3138_v61 }
  0xb0   :  { %641 = vmatmul.mubr.bf16.gmra.mrb[28].mxu0 %v3140_v62 }
  0xb1   :  { %650 = vmatprep.mubr.bf16.mxu0 %v3141_v63 }
  0xb8   :  { %651 = vmatmul.mubr.bf16.gmra.mrb[32].mxu0 %v3143_v0 }
  0xb9   :  { %660 = vmatprep.mubr.bf16.mxu0 %v3144_v1 }
  0xc0   :  { %661 = vmatmul.mubr.bf16.gmra.mrb[36].mxu0 %v3146_v2 }
  0xc1   :  { %670 = vmatprep.mubr.bf16.mxu0 %v3147_v3 }
  0xc8   :  { %671 = vmatmul.mubr.bf16.gmra.mrb[40].mxu0 %v3149_v4 }
  0xc9   :  { %680 = vmatprep.mubr.bf16.mxu0 %v3150_v5 }
  0xd0   :  { %681 = vmatmul.mubr.bf16.gmra.mrb[44].mxu0 %v3152_v7 }
  0xd1   :  { %690 = vmatprep.mubr.bf16.mxu0 %v3153_v9 }
  0xd8   :  { %691 = vmatmul.mubr.bf16.gmra.mrb[48].mxu0 %v3155_v13 }
  0xd9   :  { %700 = vmatprep.mubr.bf16.mxu0 %v3156_v15 }
  0xe0   :  { %701 = vmatmul.mubr.bf16.gmra.mrb[52].mxu0 %v3158_v19 }
  0xe1   :  { %710 = vmatprep.mubr.bf16.mxu0 %v3159_v20 }
  0xe8   :  { %711 = vmatmul.mubr.bf16.gmra.mrb[56].mxu0 %v3161_v25 }
  0xe9   :  { %720 = vmatprep.mubr.bf16.mxu0 %v3162_v26 }
  0xf0   :  { %721 = vmatmul.mubr.bf16.gmra.mrb[60].mxu0 %v3164_v31 }
 0x14b   :  { %v572_v42 = vpop.f32.mrb[0].mxu0 }
 0x14c   :  { %v573_v43 = vadd.f32 %v572_v42, %v3950_v40  ;;  %v574_v44 = vpop.f32.mrb[1].mxu0 }
 0x14d   :  { %v575_v45 = vadd.f32 %v574_v44, %v3953_v41  ;;  %v576_v46 = vpop.f32.mrb[2].mxu0 }
 0x14e   :  { %v2774_v47 = vmul.f32 -1.442695, %v573_v43  ;;  %v577_v48 = vadd.f32 %v576_v46, %v3950_v40  ;;  %v578_v49 = vpop.f32.mrb[3].mxu0 }
 0x14f   :  { %v2775_v50 = vmul.f32 -1.442695, %v575_v45  ;;  %v579_v51 = vadd.f32 %v578_v49, %v3953_v41 }
 0x150   :  { %3213 = vpow2.f32 %v2774_v47  ;;  %v2776_v52 = vmul.f32 -1.442695, %v577_v48 }
 0x151   :  { %3215 = vpow2.f32 %v2775_v50  ;;  %v2777_v53 = vmul.f32 -1.442695, %v579_v51 }
 0x152   :  { %3217 = vpow2.f32 %v2776_v52 }
 0x153   :  { %3219 = vpow2.f32 %v2777_v53  ;;  %v582_v54 = vpop.f32.mrb[4].mxu0 }
 0x154   :  { %v583_v55 = vadd.f32 %v582_v54, %v3950_v40  ;;  %v584_v56 = vpop.f32.mrb[5].mxu0 }
 0x155   :  { %v585_v57 = vadd.f32 %v584_v56, %v3953_v41  ;;  %v586_v58 = vpop.f32.mrb[6].mxu0 }
 0x156   :  { %v2778_v59 = vmul.f32 -1.442695, %v583_v55  ;;  %v587_v60 = vadd.f32 %v586_v58, %v3950_v40  ;;  %v588_v61 = vpop.f32.mrb[7].mxu0 }
 0x157   :  { %v2779_v62 = vmul.f32 -1.442695, %v585_v57  ;;  %v589_v63 = vadd.f32 %v588_v61, %v3953_v41 }
 0x158   :  { %3221 = vpow2.f32 %v2778_v59  ;;  %v2780_v0 = vmul.f32 -1.442695, %v587_v60 }
 0x159   :  { %3223 = vpow2.f32 %v2779_v62  ;;  %v2781_v1 = vmul.f32 -1.442695, %v589_v63 }
 0x15a   :  { %v3214_v2 = vpop.eup %3213  ;;  %3225 = vpow2.f32 %v2780_v0 }
 0x15b   :  { %v3216_v3 = vpop.eup %3215  ;;  %v923_v4 = vadd.f32 1.0, %v3214_v2  ;;  %3227 = vpow2.f32 %v2781_v1  ;;  %v592_v5 = vpop.f32.mrb[8].mxu0 }
 0x15c   :  { %v3218_v6 = vpop.eup %3217  ;;  %v924_v7 = vadd.f32 1.0, %v3216_v3  ;;  %v593_v8 = vadd.f32 %v592_v5, %v3950_v40  ;;  %v594_v9 = vpop.f32.mrb[9].mxu0 }
 0x15d   :  { %v3220_v10 = vpop.eup %3219  ;;  %3229 = vrcp.f32 %v923_v4  ;;  %v925_v11 = vadd.f32 1.0, %v3218_v6  ;;  %v595_v12 = vadd.f32 %v594_v9, %v3953_v41  ;;  %v596_v13 = vpop.f32.mrb[10].mxu0 }
 0x15e   :  { %3231 = vrcp.f32 %v924_v7  ;;  %v926_v14 = vadd.f32 1.0, %v3220_v10  ;;  %v2782_v15 = vmul.f32 -1.442695, %v593_v8  ;;  %v597_v16 = vadd.f32 %v596_v13, %v3950_v40  ;;  %v598_v17 = vpop.f32.mrb[11].mxu0 }
 0x15f   :  { %3233 = vrcp.f32 %v925_v11  ;;  %v2783_v18 = vmul.f32 -1.442695, %v595_v12  ;;  %v599_v19 = vadd.f32 %v598_v17, %v3953_v41 }
 0x160   :  { %3235 = vrcp.f32 %v926_v14  ;;  %v2784_v20 = vmul.f32 -1.442695, %v597_v16 }
 0x161   :  { %3237 = vpow2.f32 %v2782_v15  ;;  %v2785_v21 = vmul.f32 -1.442695, %v599_v19 }
 0x162   :  { %v3222_v22 = vpop.eup %3221  ;;  %3239 = vpow2.f32 %v2783_v18 }
 0x163   :  { %v3224_v23 = vpop.eup %3223  ;;  %v927_v24 = vadd.f32 1.0, %v3222_v22  ;;  %3241 = vpow2.f32 %v2784_v20  ;;  %v602_v25 = vpop.f32.mrb[12].mxu0 }
 0x164   :  { %v3226_v26 = vpop.eup %3225  ;;  %v928_v27 = vadd.f32 1.0, %v3224_v23  ;;  %3243 = vpow2.f32 %v2785_v21  ;;  %v603_v28 = vadd.f32 %v602_v25, %v3950_v40  ;;  %v604_v29 = vpop.f32.mrb[13].mxu0 }
 0x165   :  { %v3228_v30 = vpop.eup %3227  ;;  %3245 = vrcp.f32 %v927_v24  ;;  %v929_v31 = vadd.f32 1.0, %v3226_v26  ;;  %v605_v32 = vadd.f32 %v604_v29, %v3953_v41  ;;  %v606_v34 = vpop.f32.mrb[14].mxu0 }
 0x166   :  { %3247 = vrcp.f32 %v928_v27  ;;  %v930_v35 = vadd.f32 1.0, %v3228_v30  ;;  %v2786_v38 = vmul.f32 -1.442695, %v603_v28  ;;  %v607_v39 = vadd.f32 %v606_v34, %v3950_v40  ;;  %v608_v42 = vpop.f32.mrb[15].mxu0 }
 0x167   :  { %v3230_v43 = vpop.eup %3229  ;;  %3249 = vrcp.f32 %v929_v31  ;;  %v2787_v44 = vmul.f32 -1.442695, %v605_v32  ;;  %v609_v45 = vadd.f32 %v608_v42, %v3953_v41 }
 0x168   :  { %v3232_v46 = vpop.eup %3231  ;;  %3251 = vrcp.f32 %v930_v35  ;;  %v2788_v47 = vmul.f32 -1.442695, %v607_v39 }
 0x169   :  { %v3234_v48 = vpop.eup %3233  ;;  %v2998_v49 = vpack.c.bf16 %v3232_v46, %v3230_v43  ;;  %3253 = vpow2.f32 %v2786_v38  ;;  %v2789_v50 = vmul.f32 -1.442695, %v609_v45 }
 0x16a   :  { %v3236_v51 = vpop.eup %3235  ;;  %3255 = vpow2.f32 %v2787_v44  ;;  %v1115_v52 = vpack.c.bf16 %v3234_v48, %v3230_v43 }
 0x16b   :  { %v3238_v53 = vpop.eup %3237  ;;  %1307 = vst [vmem:[#allocation10] sm:$0xff] %v2998_v49  ;;  %v2999_v54 = vpack.c.bf16 %v3236_v51, %v3234_v48  ;;  %3257 = vpow2.f32 %v2788_v47  ;;  %v612_v55 = vpop.f32.mrb[16].mxu0  ;;  %v1116_v56 = vpack.c.bf16 %v3236_v51, %v3232_v46 }
 0x16c   :  { %v3240_v57 = vpop.eup %3239  ;;  %v931_v58 = vadd.f32 1.0, %v3238_v53  ;;  %3259 = vpow2.f32 %v2789_v50  ;;  %v613_v59 = vadd.f32 %v612_v55, %v3950_v40  ;;  %v614_v60 = vpop.f32.mrb[17].mxu0 }
 0x16d   :  { %v3242_v61 = vpop.eup %3241  ;;  %1308 = vst [vmem:[#allocation10 + $0x8] sm:$0xff] %v2999_v54  ;;  %v932_v62 = vadd.f32 1.0, %v3240_v57  ;;  %v615_v63 = vadd.f32 %v614_v60, %v3953_v41  ;;  %v616_v0 = vpop.f32.mrb[18].mxu0  ;;  %1627 = vmatprep.mubr.bf16.mxu1 %v1116_v56 }
 0x16e   :  { %v3244_v1 = vpop.eup %3243  ;;  %3261 = vrcp.f32 %v931_v58  ;;  %v933_v2 = vadd.f32 1.0, %v3242_v61  ;;  %v2790_v3 = vmul.f32 -1.442695, %v613_v59  ;;  %v617_v4 = vadd.f32 %v616_v0, %v3950_v40  ;;  %v618_v5 = vpop.f32.mrb[19].mxu0  ;;  %1628 = vmatmul.mubr.bf16.vlgmr.msra.gmra.mrb[0].mxu1 %v1115_v52 }
 0x16f   :  { %v3246_v6 = vpop.eup %3245  ;;  %3263 = vrcp.f32 %v932_v62  ;;  %v934_v7 = vadd.f32 1.0, %v3244_v1  ;;  %v2791_v8 = vmul.f32 -1.442695, %v615_v63  ;;  %v619_v9 = vadd.f32 %v618_v5, %v3953_v41 }
 0x170   :  { %v3248_v10 = vpop.eup %3247  ;;  %3265 = vrcp.f32 %v933_v2  ;;  %v2792_v11 = vmul.f32 -1.442695, %v617_v4 }
 0x171   :  { %v3250_v12 = vpop.eup %3249  ;;  %v3000_v13 = vpack.c.bf16 %v3248_v10, %v3246_v6  ;;  %3267 = vrcp.f32 %v934_v7  ;;  %v2793_v14 = vmul.f32 -1.442695, %v619_v9 }
 0x172   :  { %v3252_v15 = vpop.eup %3251  ;;  %3269 = vpow2.f32 %v2790_v3  ;;  %v1117_v16 = vpack.c.bf16 %v3250_v12, %v3246_v6 }
 0x173   :  { %v3254_v17 = vpop.eup %3253  ;;  %1309 = vst [vmem:[#allocation10 + $0x10] sm:$0xff] %v3000_v13  ;;  %v3001_v18 = vpack.c.bf16 %v3252_v15, %v3250_v12  ;;  %3271 = vpow2.f32 %v2791_v8  ;;  %v622_v19 = vpop.f32.mrb[20].mxu0  ;;  %v1118_v20 = vpack.c.bf16 %v3252_v15, %v3248_v10 }
 0x174   :  { %v3256_v21 = vpop.eup %3255  ;;  %v935_v22 = vadd.f32 1.0, %v3254_v17  ;;  %3273 = vpow2.f32 %v2792_v11  ;;  %v623_v23 = vadd.f32 %v622_v19, %v3950_v40  ;;  %v624_v24 = vpop.f32.mrb[21].mxu0 }
 0x175   :  { %v3258_v25 = vpop.eup %3257  ;;  %1310 = vst [vmem:[#allocation10 + $0x18] sm:$0xff] %v3001_v18  ;;  %v936_v26 = vadd.f32 1.0, %v3256_v21  ;;  %3275 = vpow2.f32 %v2793_v14  ;;  %v625_v27 = vadd.f32 %v624_v24, %v3953_v41  ;;  %v626_v28 = vpop.f32.mrb[22].mxu0  ;;  %1637 = vmatprep.mubr.bf16.mxu1 %v1118_v20 }
 0x176   :  { %v3260_v29 = vpop.eup %3259  ;;  %3277 = vrcp.f32 %v935_v22  ;;  %v937_v30 = vadd.f32 1.0, %v3258_v25  ;;  %v2794_v31 = vmul.f32 -1.442695, %v623_v23  ;;  %v627_v32 = vadd.f32 %v626_v28, %v3950_v40  ;;  %v628_v34 = vpop.f32.mrb[23].mxu0  ;;  %1638 = vmatmul.mubr.bf16.gmra.mrb[4].mxu1 %v1117_v16 }
 0x177   :  { %3279 = vrcp.f32 %v936_v26  ;;  %v938_v35 = vadd.f32 1.0, %v3260_v29  ;;  %v2795_v38 = vmul.f32 -1.442695, %v625_v27  ;;  %v629_v39 = vadd.f32 %v628_v34, %v3953_v41 }
 0x178   :  { %v3262_v42 = vpop.eup %3261  ;;  %3281 = vrcp.f32 %v937_v30  ;;  %v2796_v43 = vmul.f32 -1.442695, %v627_v32 }
 0x179   :  { %v3264_v44 = vpop.eup %3263  ;;  %3283 = vrcp.f32 %v938_v35  ;;  %v2797_v45 = vmul.f32 -1.442695, %v629_v39 }
 0x17a   :  { %v3266_v46 = vpop.eup %3265  ;;  %v3002_v47 = vpack.c.bf16 %v3264_v44, %v3262_v42  ;;  %3285 = vpow2.f32 %v2794_v31 }
 0x17b   :  { %v3268_v48 = vpop.eup %3267  ;;  %3287 = vpow2.f32 %v2795_v38  ;;  %v632_v49 = vpop.f32.mrb[24].mxu0  ;;  %v1119_v50 = vpack.c.bf16 %v3266_v46, %v3262_v42 }
 0x17c   :  { %v3270_v51 = vpop.eup %3269  ;;  %1311 = vst [vmem:[#allocation10 + $0x20] sm:$0xff] %v3002_v47  ;;  %v3003_v52 = vpack.c.bf16 %v3268_v48, %v3266_v46  ;;  %3289 = vpow2.f32 %v2796_v43  ;;  %v633_v53 = vadd.f32 %v632_v49, %v3950_v40  ;;  %v634_v54 = vpop.f32.mrb[25].mxu0  ;;  %v1120_v55 = vpack.c.bf16 %v3268_v48, %v3264_v44 }
 0x17d   :  { %v3272_v56 = vpop.eup %3271  ;;  %v939_v57 = vadd.f32 1.0, %v3270_v51  ;;  %3291 = vpow2.f32 %v2797_v45  ;;  %v635_v58 = vadd.f32 %v634_v54, %v3953_v41  ;;  %v636_v59 = vpop.f32.mrb[26].mxu0 }
 0x17e   :  { %v3274_v60 = vpop.eup %3273  ;;  %1312 = vst [vmem:[#allocation10 + $0x28] sm:$0xff] %v3003_v52  ;;  %v940_v61 = vadd.f32 1.0, %v3272_v56  ;;  %v637_v62 = vadd.f32 %v636_v59, %v3950_v40  ;;  %1647 = vmatprep.mubr.bf16.mxu1 %v1120_v55  ;;  %v638_v63 = vpop.f32.mrb[27].mxu0  ;;  %v2798_v2 = vmul.f32 -1.442695, %v633_v53 }
 0x17f   :  { %v3276_v0 = vpop.eup %3275  ;;  %3293 = vrcp.f32 %v939_v57  ;;  %v941_v1 = vadd.f32 1.0, %v3274_v60  ;;  %v639_v3 = vadd.f32 %v638_v63, %v3953_v41  ;;  %1648 = vmatmul.mubr.bf16.gmra.mrb[8].mxu1 %v1119_v50  ;;  %v2799_v6 = vmul.f32 -1.442695, %v635_v58 }
 0x180   :  { %v3278_v4 = vpop.eup %3277  ;;  %3295 = vrcp.f32 %v940_v61  ;;  %v942_v5 = vadd.f32 1.0, %v3276_v0  ;;  %v2800_v8 = vmul.f32 -1.442695, %v637_v62 }
 0x181   :  { %v3280_v7 = vpop.eup %3279  ;;  %3297 = vrcp.f32 %v941_v1  ;;  %v2801_v11 = vmul.f32 -1.442695, %v639_v3 }
 0x182   :  { %v3282_v9 = vpop.eup %3281  ;;  %v3004_v10 = vpack.c.bf16 %v3280_v7, %v3278_v4  ;;  %3299 = vrcp.f32 %v942_v5 }
 0x183   :  { %v3284_v12 = vpop.eup %3283  ;;  %3301 = vpow2.f32 %v2798_v2  ;;  %v642_v13 = vpop.f32.mrb[28].mxu0  ;;  %v1121_v14 = vpack.c.bf16 %v3282_v9, %v3278_v4 }
 0x184   :  { %v3286_v15 = vpop.eup %3285  ;;  %1313 = vst [vmem:[#allocation10 + $0x30] sm:$0xff] %v3004_v10  ;;  %v3005_v16 = vpack.c.bf16 %v3284_v12, %v3282_v9  ;;  %3303 = vpow2.f32 %v2799_v6  ;;  %v643_v17 = vadd.f32 %v642_v13, %v3950_v40  ;;  %v644_v18 = vpop.f32.mrb[29].mxu0  ;;  %v1122_v19 = vpack.c.bf16 %v3284_v12, %v3280_v7 }
 0x185   :  { %v3288_v20 = vpop.eup %3287  ;;  %v943_v21 = vadd.f32 1.0, %v3286_v15  ;;  %3305 = vpow2.f32 %v2800_v8  ;;  %v645_v22 = vadd.f32 %v644_v18, %v3953_v41  ;;  %v646_v23 = vpop.f32.mrb[30].mxu0 }
 0x186   :  { %v3290_v24 = vpop.eup %3289  ;;  %1314 = vst [vmem:[#allocation10 + $0x38] sm:$0xff] %v3005_v16  ;;  %v944_v25 = vadd.f32 1.0, %v3288_v20  ;;  %3307 = vpow2.f32 %v2801_v11  ;;  %v647_v26 = vadd.f32 %v646_v23, %v3950_v40  ;;  %1657 = vmatprep.mubr.bf16.mxu1 %v1122_v19  ;;  %v648_v27 = vpop.f32.mrb[31].mxu0  ;;  %v2802_v30 = vmul.f32 -1.442695, %v643_v17 }
 0x187   :  { %v3292_v28 = vpop.eup %3291  ;;  %3309 = vrcp.f32 %v943_v21  ;;  %v945_v29 = vadd.f32 1.0, %v3290_v24  ;;  %v649_v31 = vadd.f32 %v648_v27, %v3953_v41  ;;  %1658 = vmatmul.mubr.bf16.gmra.mrb[12].mxu1 %v1121_v14  ;;  %v2803_v34 = vmul.f32 -1.442695, %v645_v22 }
 0x188   :  { %3311 = vrcp.f32 %v944_v25  ;;  %v946_v32 = vadd.f32 1.0, %v3292_v28  ;;  %v2804_v38 = vmul.f32 -1.442695, %v647_v26 }
 0x189   :  { %v3294_v35 = vpop.eup %3293  ;;  %3313 = vrcp.f32 %v945_v29  ;;  %v2805_v42 = vmul.f32 -1.442695, %v649_v31 }
 0x18a   :  { %v3296_v39 = vpop.eup %3295  ;;  %3315 = vrcp.f32 %v946_v32 }
 0x18b   :  { %v3298_v43 = vpop.eup %3297  ;;  %v3006_v44 = vpack.c.bf16 %v3296_v39, %v3294_v35  ;;  %3317 = vpow2.f32 %v2802_v30  ;;  %v652_v45 = vpop.f32.mrb[32].mxu0 }
 0x18c   :  { %v3300_v46 = vpop.eup %3299  ;;  %3319 = vpow2.f32 %v2803_v34  ;;  %v653_v47 = vadd.f32 %v652_v45, %v3950_v40  ;;  %v654_v48 = vpop.f32.mrb[33].mxu0  ;;  %v1123_v49 = vpack.c.bf16 %v3298_v43, %v3294_v35 }
 0x18d   :  { %v3302_v50 = vpop.eup %3301  ;;  %1315 = vst [vmem:[#allocation10 + $0x40] sm:$0xff] %v3006_v44  ;;  %v3007_v51 = vpack.c.bf16 %v3300_v46, %v3298_v43  ;;  %3321 = vpow2.f32 %v2804_v38  ;;  %v655_v52 = vadd.f32 %v654_v48, %v3953_v41  ;;  %v656_v53 = vpop.f32.mrb[34].mxu0  ;;  %v1124_v54 = vpack.c.bf16 %v3300_v46, %v3296_v39 }
 0x18e   :  { %v3304_v55 = vpop.eup %3303  ;;  %v947_v56 = vadd.f32 1.0, %v3302_v50  ;;  %3323 = vpow2.f32 %v2805_v42  ;;  %v657_v57 = vadd.f32 %v656_v53, %v3950_v40  ;;  %v658_v58 = vpop.f32.mrb[35].mxu0  ;;  %v2806_v0 = vmul.f32 -1.442695, %v653_v47 }
 0x18f   :  { %v3306_v59 = vpop.eup %3305  ;;  %1316 = vst [vmem:[#allocation10 + $0x48] sm:$0xff] %v3007_v51  ;;  %v948_v60 = vadd.f32 1.0, %v3304_v55  ;;  %1667 = vmatprep.mubr.bf16.mxu1 %v1124_v54  ;;  %v659_v61 = vadd.f32 %v658_v58, %v3953_v41  ;;  %v2807_v3 = vmul.f32 -1.442695, %v655_v52 }
 0x190   :  { %v3308_v62 = vpop.eup %3307  ;;  %3325 = vrcp.f32 %v947_v56  ;;  %v949_v63 = vadd.f32 1.0, %v3306_v59  ;;  %1668 = vmatmul.mubr.bf16.gmra.mrb[16].mxu1 %v1123_v49  ;;  %v2808_v5 = vmul.f32 -1.442695, %v657_v57 }
 0x191   :  { %v3310_v1 = vpop.eup %3309  ;;  %3327 = vrcp.f32 %v948_v60  ;;  %v950_v2 = vadd.f32 1.0, %v3308_v62  ;;  %v2809_v8 = vmul.f32 -1.442695, %v659_v61 }
 0x192   :  { %v3312_v4 = vpop.eup %3311  ;;  %3329 = vrcp.f32 %v949_v63 }
 0x193   :  { %v3314_v6 = vpop.eup %3313  ;;  %v3008_v7 = vpack.c.bf16 %v3312_v4, %v3310_v1  ;;  %3331 = vrcp.f32 %v950_v2  ;;  %v662_v9 = vpop.f32.mrb[36].mxu0 }
 0x194   :  { %v3316_v10 = vpop.eup %3315  ;;  %3333 = vpow2.f32 %v2806_v0  ;;  %v663_v11 = vadd.f32 %v662_v9, %v3950_v40  ;;  %v664_v12 = vpop.f32.mrb[37].mxu0  ;;  %v1125_v13 = vpack.c.bf16 %v3314_v6, %v3310_v1 }
 0x195   :  { %v3318_v14 = vpop.eup %3317  ;;  %1317 = vst [vmem:[#allocation10 + $0x50] sm:$0xff] %v3008_v7  ;;  %v3009_v15 = vpack.c.bf16 %v3316_v10, %v3314_v6  ;;  %3335 = vpow2.f32 %v2807_v3  ;;  %v665_v16 = vadd.f32 %v664_v12, %v3953_v41  ;;  %v666_v17 = vpop.f32.mrb[38].mxu0  ;;  %v1126_v18 = vpack.c.bf16 %v3316_v10, %v3312_v4 }
 0x196   :  { %v3320_v19 = vpop.eup %3319  ;;  %v951_v20 = vadd.f32 1.0, %v3318_v14  ;;  %3337 = vpow2.f32 %v2808_v5  ;;  %v667_v21 = vadd.f32 %v666_v17, %v3950_v40  ;;  %v668_v22 = vpop.f32.mrb[39].mxu0  ;;  %v2810_v28 = vmul.f32 -1.442695, %v663_v11 }
 0x197   :  { %v3322_v23 = vpop.eup %3321  ;;  %1318 = vst [vmem:[#allocation10 + $0x58] sm:$0xff] %v3009_v15  ;;  %v952_v24 = vadd.f32 1.0, %v3320_v19  ;;  %3339 = vpow2.f32 %v2809_v8  ;;  %1677 = vmatprep.mubr.bf16.mxu1 %v1126_v18  ;;  %v669_v25 = vadd.f32 %v668_v22, %v3953_v41  ;;  %v2811_v30 = vmul.f32 -1.442695, %v665_v16 }
 0x198   :  { %v3324_v26 = vpop.eup %3323  ;;  %3341 = vrcp.f32 %v951_v20  ;;  %v953_v27 = vadd.f32 1.0, %v3322_v23  ;;  %1678 = vmatmul.mubr.bf16.gmra.mrb[20].mxu1 %v1125_v13  ;;  %v2812_v32 = vmul.f32 -1.442695, %v667_v21 }
 0x199   :  { %3343 = vrcp.f32 %v952_v24  ;;  %v954_v29 = vadd.f32 1.0, %v3324_v26  ;;  %v2813_v35 = vmul.f32 -1.442695, %v669_v25 }
 0x19a   :  { %v3326_v31 = vpop.eup %3325  ;;  %3345 = vrcp.f32 %v953_v27 }
 0x19b   :  { %v3328_v34 = vpop.eup %3327  ;;  %3347 = vrcp.f32 %v954_v29  ;;  %v672_v38 = vpop.f32.mrb[40].mxu0 }
 0x19c   :  { %v3330_v39 = vpop.eup %3329  ;;  %v3010_v42 = vpack.c.bf16 %v3328_v34, %v3326_v31  ;;  %3349 = vpow2.f32 %v2810_v28  ;;  %v673_v43 = vadd.f32 %v672_v38, %v3950_v40  ;;  %v674_v44 = vpop.f32.mrb[41].mxu0 }
 0x19d   :  { %v3332_v45 = vpop.eup %3331  ;;  %3351 = vpow2.f32 %v2811_v30  ;;  %v675_v46 = vadd.f32 %v674_v44, %v3953_v41  ;;  %v676_v47 = vpop.f32.mrb[42].mxu0  ;;  %v1127_v48 = vpack.c.bf16 %v3330_v39, %v3326_v31 }
 0x19e   :  { %v3334_v49 = vpop.eup %3333  ;;  %1319 = vst [vmem:[#allocation10 + $0x60] sm:$0xff] %v3010_v42  ;;  %v3011_v50 = vpack.c.bf16 %v3332_v45, %v3330_v39  ;;  %3353 = vpow2.f32 %v2812_v32  ;;  %v2814_v51 = vmul.f32 -1.442695, %v673_v43  ;;  %v677_v52 = vadd.f32 %v676_v47, %v3950_v40  ;;  %v678_v53 = vpop.f32.mrb[43].mxu0 }
 0x19f   :  { %v3336_v54 = vpop.eup %3335  ;;  %v955_v55 = vadd.f32 1.0, %v3334_v49  ;;  %3355 = vpow2.f32 %v2813_v35  ;;  %v1128_v56 = vpack.c.bf16 %v3332_v45, %v3328_v34  ;;  %v679_v59 = vadd.f32 %v678_v53, %v3953_v41 }
 0x1a0   :  { %v3338_v57 = vpop.eup %3337  ;;  %1320 = vst [vmem:[#allocation10 + $0x68] sm:$0xff] %v3011_v50  ;;  %v956_v58 = vadd.f32 1.0, %v3336_v54  ;;  %3357 = vpow2.f32 %v2814_v51  ;;  %v2815_v62 = vmul.f32 -1.442695, %v675_v46  ;;  %v2816_v1 = vmul.f32 -1.442695, %v677_v52 }
 0x1a1   :  { %v3340_v60 = vpop.eup %3339  ;;  %3359 = vrcp.f32 %v955_v55  ;;  %v957_v61 = vadd.f32 1.0, %v3338_v57  ;;  %1687 = vmatprep.mubr.bf16.mxu1 %v1128_v56  ;;  %v2817_v3 = vmul.f32 -1.442695, %v679_v59 }
 0x1a2   :  { %v3342_v63 = vpop.eup %3341  ;;  %3361 = vrcp.f32 %v956_v58  ;;  %v958_v0 = vadd.f32 1.0, %v3340_v60  ;;  %1688 = vmatmul.mubr.bf16.gmra.mrb[24].mxu1 %v1127_v48 }
 0x1a3   :  { %v3344_v2 = vpop.eup %3343  ;;  %3363 = vrcp.f32 %v957_v61  ;;  %v682_v4 = vpop.f32.mrb[44].mxu0 }
 0x1a4   :  { %v3346_v5 = vpop.eup %3345  ;;  %v3012_v6 = vpack.c.bf16 %v3344_v2, %v3342_v63  ;;  %3365 = vrcp.f32 %v958_v0  ;;  %v683_v7 = vadd.f32 %v682_v4, %v3950_v40  ;;  %v684_v8 = vpop.f32.mrb[45].mxu0 }
 0x1a5   :  { %v3348_v9 = vpop.eup %3347  ;;  %3367 = vpow2.f32 %v2815_v62  ;;  %v686_v10 = vpop.f32.mrb[46].mxu0  ;;  %v1129_v11 = vpack.c.bf16 %v3346_v5, %v3342_v63  ;;  %v685_v15 = vadd.f32 %v684_v8, %v3953_v41 }
 0x1a6   :  { %v3350_v12 = vpop.eup %3349  ;;  %1321 = vst [vmem:[#allocation10 + $0x70] sm:$0xff] %v3012_v6  ;;  %v3013_v13 = vpack.c.bf16 %v3348_v9, %v3346_v5  ;;  %3369 = vpow2.f32 %v2816_v1  ;;  %v2818_v14 = vmul.f32 -1.442695, %v683_v7  ;;  %v688_v16 = vpop.f32.mrb[47].mxu0  ;;  %v687_v19 = vadd.f32 %v686_v10, %v3950_v40 }
 0x1a7   :  { %v3352_v17 = vpop.eup %3351  ;;  %v959_v18 = vadd.f32 1.0, %v3350_v12  ;;  %3371 = vpow2.f32 %v2817_v3  ;;  %v1130_v20 = vpack.c.bf16 %v3348_v9, %v3344_v2  ;;  %v689_v23 = vadd.f32 %v688_v16, %v3953_v41 }
 0x1a8   :  { %v3354_v21 = vpop.eup %3353  ;;  %1322 = vst [vmem:[#allocation10 + $0x78] sm:$0xff] %v3013_v13  ;;  %v960_v22 = vadd.f32 1.0, %v3352_v17  ;;  %3373 = vpow2.f32 %v2818_v14  ;;  %v2819_v28 = vmul.f32 -1.442695, %v685_v15  ;;  %v2820_v31 = vmul.f32 -1.442695, %v687_v19 }
 0x1a9   :  { %v3356_v24 = vpop.eup %3355  ;;  %3375 = vrcp.f32 %v959_v18  ;;  %v961_v25 = vadd.f32 1.0, %v3354_v21  ;;  %1697 = vmatprep.mubr.bf16.mxu1 %v1130_v20  ;;  %v2821_v35 = vmul.f32 -1.442695, %v689_v23 }
 0x1aa   :  { %v3358_v26 = vpop.eup %3357  ;;  %3377 = vrcp.f32 %v960_v22  ;;  %v962_v27 = vadd.f32 1.0, %v3356_v24  ;;  %1698 = vmatmul.mubr.bf16.gmra.mrb[28].mxu1 %v1129_v11 }
 0x1ab   :  { %v3360_v29 = vpop.eup %3359  ;;  %3379 = vrcp.f32 %v961_v25  ;;  %v963_v30 = vadd.f32 1.0, %v3358_v26  ;;  %v692_v32 = vpop.f32.mrb[48].mxu0 }
 0x1ac   :  { %v3362_v34 = vpop.eup %3361  ;;  %3381 = vrcp.f32 %v962_v27  ;;  %v693_v38 = vadd.f32 %v692_v32, %v3950_v40  ;;  %v694_v39 = vpop.f32.mrb[49].mxu0 }
 0x1ad   :  { %v3364_v42 = vpop.eup %3363  ;;  %v3014_v43 = vpack.c.bf16 %v3362_v34, %v3360_v29  ;;  %3383 = vrcp.f32 %v963_v30  ;;  %v696_v44 = vpop.f32.mrb[50].mxu0  ;;  %v695_v47 = vadd.f32 %v694_v39, %v3953_v41 }
 0x1ae   :  { %v3366_v45 = vpop.eup %3365  ;;  %3385 = vpow2.f32 %v2819_v28  ;;  %v2822_v46 = vmul.f32 -1.442695, %v693_v38  ;;  %v698_v48 = vpop.f32.mrb[51].mxu0  ;;  %v1131_v49 = vpack.c.bf16 %v3364_v42, %v3360_v29  ;;  %v697_v52 = vadd.f32 %v696_v44, %v3950_v40 }
 0x1af   :  { %v3368_v50 = vpop.eup %3367  ;;  %1323 = vst [vmem:[#allocation10 + $0x80] sm:$0xff] %v3014_v43  ;;  %v3015_v51 = vpack.c.bf16 %v3366_v45, %v3364_v42  ;;  %3387 = vpow2.f32 %v2820_v31  ;;  %v1132_v53 = vpack.c.bf16 %v3366_v45, %v3362_v34  ;;  %v699_v56 = vadd.f32 %v698_v48, %v3953_v41 }
 0x1b0   :  { %v3370_v54 = vpop.eup %3369  ;;  %v964_v55 = vadd.f32 1.0, %v3368_v50  ;;  %3389 = vpow2.f32 %v2821_v35  ;;  %v2823_v61 = vmul.f32 -1.442695, %v695_v47  ;;  %v2824_v0 = vmul.f32 -1.442695, %v697_v52 }
 0x1b1   :  { %v3372_v57 = vpop.eup %3371  ;;  %1324 = vst [vmem:[#allocation10 + $0x88] sm:$0xff] %v3015_v51  ;;  %v965_v58 = vadd.f32 1.0, %v3370_v54  ;;  %3391 = vpow2.f32 %v2822_v46  ;;  %1707 = vmatprep.mubr.bf16.mxu1 %v1132_v53  ;;  %v2825_v3 = vmul.f32 -1.442695, %v699_v56 }
 0x1b2   :  { %v3374_v59 = vpop.eup %3373  ;;  %3393 = vrcp.f32 %v964_v55  ;;  %v966_v60 = vadd.f32 1.0, %v3372_v57  ;;  %1708 = vmatmul.mubr.bf16.gmra.mrb[32].mxu1 %v1131_v49 }
 0x1b3   :  { %v3376_v62 = vpop.eup %3375  ;;  %3395 = vrcp.f32 %v965_v58  ;;  %v967_v63 = vadd.f32 1.0, %v3374_v59  ;;  %v702_v1 = vpop.f32.mrb[52].mxu0 }
 0x1b4   :  { %v3378_v2 = vpop.eup %3377  ;;  %3397 = vrcp.f32 %v966_v60  ;;  %v703_v4 = vadd.f32 %v702_v1, %v3950_v40  ;;  %v704_v5 = vpop.f32.mrb[53].mxu0 }
 0x1b5   :  { %v3380_v6 = vpop.eup %3379  ;;  %v3016_v7 = vpack.c.bf16 %v3378_v2, %v3376_v62  ;;  %3399 = vrcp.f32 %v967_v63  ;;  %v705_v8 = vadd.f32 %v704_v5, %v3953_v41  ;;  %v706_v9 = vpop.f32.mrb[54].mxu0 }
 0x1b6   :  { %v3382_v10 = vpop.eup %3381  ;;  %3401 = vpow2.f32 %v2823_v61  ;;  %v2826_v11 = vmul.f32 -1.442695, %v703_v4  ;;  %v707_v12 = vadd.f32 %v706_v9, %v3950_v40  ;;  %v708_v13 = vpop.f32.mrb[55].mxu0  ;;  %v1133_v14 = vpack.c.bf16 %v3380_v6, %v3376_v62 }
 0x1b7   :  { %v3384_v15 = vpop.eup %3383  ;;  %1325 = vst [vmem:[#allocation10 + $0x90] sm:$0xff] %v3016_v7  ;;  %v3017_v16 = vpack.c.bf16 %v3382_v10, %v3380_v6  ;;  %3403 = vpow2.f32 %v2824_v0  ;;  %v2827_v17 = vmul.f32 -1.442695, %v705_v8  ;;  %v1134_v18 = vpack.c.bf16 %v3382_v10, %v3378_v2 }
 0x1b8   :  { %v3386_v19 = vpop.eup %3385  ;;  %3405 = vpow2.f32 %v2825_v3  ;;  %v709_v20 = vadd.f32 %v708_v13, %v3953_v41  ;;  %v2828_v27 = vmul.f32 -1.442695, %v707_v12 }
 0x1b9   :  { %v3388_v21 = vpop.eup %3387  ;;  %1326 = vst [vmem:[#allocation10 + $0x98] sm:$0xff] %v3017_v16  ;;  %v968_v22 = vadd.f32 1.0, %v3386_v19  ;;  %3407 = vpow2.f32 %v2826_v11  ;;  %1717 = vmatprep.mubr.bf16.mxu1 %v1134_v18 }
 0x1ba   :  { %v3390_v23 = vpop.eup %3389  ;;  %v969_v24 = vadd.f32 1.0, %v3388_v21  ;;  %3409 = vpow2.f32 %v2827_v17  ;;  %1718 = vmatmul.mubr.bf16.gmra.mrb[36].mxu1 %v1133_v14  ;;  %v2829_v31 = vmul.f32 -1.442695, %v709_v20 }
 0x1bb   :  { %v3392_v25 = vpop.eup %3391  ;;  %3411 = vrcp.f32 %v968_v22  ;;  %v970_v26 = vadd.f32 1.0, %v3390_v23  ;;  %v712_v28 = vpop.f32.mrb[56].mxu0 }
 0x1bc   :  { %v3394_v29 = vpop.eup %3393  ;;  %3413 = vrcp.f32 %v969_v24  ;;  %v971_v30 = vadd.f32 1.0, %v3392_v25  ;;  %v713_v32 = vadd.f32 %v712_v28, %v3950_v40  ;;  %v714_v34 = vpop.f32.mrb[57].mxu0 }
 0x1bd   :  { %v3396_v35 = vpop.eup %3395  ;;  %v3018_v38 = vpack.c.bf16 %v3394_v29, %v3384_v15  ;;  %3415 = vrcp.f32 %v970_v26  ;;  %v715_v39 = vadd.f32 %v714_v34, %v3953_v41  ;;  %v716_v42 = vpop.f32.mrb[58].mxu0 }
 0x1be   :  { %v3398_v43 = vpop.eup %3397  ;;  %3417 = vrcp.f32 %v971_v30  ;;  %v2830_v44 = vmul.f32 -1.442695, %v713_v32  ;;  %v718_v45 = vpop.f32.mrb[59].mxu0  ;;  %v1135_v46 = vpack.c.bf16 %v3396_v35, %v3384_v15  ;;  %v717_v52 = vadd.f32 %v716_v42, %v3950_v40 }
 0x1bf   :  { %v3400_v47 = vpop.eup %3399  ;;  %1327 = vst [vmem:[#allocation10 + $0xa0] sm:$0xff] %v3018_v38  ;;  %v3019_v48 = vpack.c.bf16 %v3398_v43, %v3396_v35  ;;  %3419 = vpow2.f32 %v2828_v27  ;;  %v2831_v49 = vmul.f32 -1.442695, %v715_v39  ;;  %v1136_v50 = vpack.c.bf16 %v3398_v43, %v3394_v29 }
 0x1c0   :  { %v3402_v51 = vpop.eup %3401  ;;  %3421 = vpow2.f32 %v2829_v31  ;;  %v719_v55 = vadd.f32 %v718_v45, %v3953_v41  ;;  %v2832_v63 = vmul.f32 -1.442695, %v717_v52 }
 0x1c1   :  { %v3404_v53 = vpop.eup %3403  ;;  %1328 = vst [vmem:[#allocation10 + $0xa8] sm:$0xff] %v3019_v48  ;;  %v972_v54 = vadd.f32 1.0, %v3402_v51  ;;  %3423 = vpow2.f32 %v2830_v44  ;;  %1727 = vmatprep.mubr.bf16.mxu1 %v1136_v50 }
 0x1c2   :  { %v3406_v56 = vpop.eup %3405  ;;  %v973_v57 = vadd.f32 1.0, %v3404_v53  ;;  %3425 = vpow2.f32 %v2831_v49  ;;  %1728 = vmatmul.mubr.bf16.gmra.mrb[40].mxu1 %v1135_v46  ;;  %v2833_v4 = vmul.f32 -1.442695, %v719_v55 }
 0x1c3   :  { %v3408_v58 = vpop.eup %3407  ;;  %3427 = vrcp.f32 %v972_v54  ;;  %v974_v59 = vadd.f32 1.0, %v3406_v56  ;;  %v722_v60 = vpop.f32.mrb[60].mxu0 }
 0x1c4   :  { %v3410_v61 = vpop.eup %3409  ;;  %3429 = vrcp.f32 %v973_v57  ;;  %v975_v62 = vadd.f32 1.0, %v3408_v58  ;;  %v723_v0 = vadd.f32 %v722_v60, %v3950_v40  ;;  %v724_v1 = vpop.f32.mrb[61].mxu0 }
 0x1c5   :  { %v3412_v2 = vpop.eup %3411  ;;  %3431 = vrcp.f32 %v974_v59  ;;  %v976_v3 = vadd.f32 1.0, %v3410_v61  ;;  %v725_v5 = vadd.f32 %v724_v1, %v3953_v41  ;;  %v726_v6 = vpop.f32.mrb[62].mxu0 }
 0x1c6   :  { %v3414_v7 = vpop.eup %3413  ;;  %v3020_v8 = vpack.c.bf16 %v3412_v2, %v3400_v47  ;;  %3433 = vrcp.f32 %v975_v62  ;;  %v2834_v9 = vmul.f32 -1.442695, %v723_v0  ;;  %v728_v10 = vpop.f32.mrb[63].mxu0  ;;  %v727_v16 = vadd.f32 %v726_v6, %v3950_v40 }
 0x1c7   :  { %v3416_v11 = vpop.eup %3415  ;;  %3435 = vrcp.f32 %v976_v3  ;;  %v2835_v12 = vmul.f32 -1.442695, %v725_v5  ;;  %v1137_v13 = vpack.c.bf16 %v3414_v7, %v3400_v47  ;;  %v729_v19 = vadd.f32 %v728_v10, %v3953_v41 }
 0x1c8   :  { %v3418_v14 = vpop.eup %3417  ;;  %1329 = vst [vmem:[#allocation10 + $0xb0] sm:$0xff] %v3020_v8  ;;  %v3021_v15 = vpack.c.bf16 %v3416_v11, %v3414_v7  ;;  %3437 = vpow2.f32 %v2832_v63  ;;  %v1138_v17 = vpack.c.bf16 %v3416_v11, %v3412_v2  ;;  %v2836_v26 = vmul.f32 -1.442695, %v727_v16  ;;  %v1983_v11 = vld [vmem:[%s4129_s4] sm:$0x3]  ;;  %s3848_s4 = smov [#allocation10]  }
 0x1c9   :  { %v3420_v18 = vpop.eup %3419  ;;  %3439 = vpow2.f32 %v2833_v4  ;;  %v2837_v28 = vmul.f32 -1.442695, %v729_v19  ;;  %s2693_s13 = sshll.u32 %s3848_s4, 4  ;;  %s2694_s13 = int_to_ptr.vmem [resolvable:$true] %s2693_s13 }
 0x1ca   :  { %v3422_v20 = vpop.eup %3421  ;;  %1330 = vst [vmem:[#allocation10 + $0xb8] sm:$0xff] %v3021_v15  ;;  %v977_v21 = vadd.f32 1.0, %v3420_v18  ;;  %3441 = vpow2.f32 %v2834_v9  ;;  %1737 = vmatprep.mubr.bf16.mxu1 %v1138_v17  ;;  %s3791_s14 = scalar_lea.vmem %s2694_s13, 4096  ;;  %p3796_p11 = scmp.lt.s32.totalorder %s2694_s13, %s2694_s13 }
 0x1cb   :  { %v3424_v22 = vpop.eup %3423  ;;  %v978_v23 = vadd.f32 1.0, %v3422_v20  ;;  %3443 = vpow2.f32 %v2835_v12  ;;  %1738 = vmatmul.mubr.bf16.gmra.mrb[44].mxu1 %v1137_v13  ;;  %v1984_v12 = vunpack.c.l.bf16 %v1983_v11  ;;  %p3792_p10 = scmp.ne.s32.totalorder %s2694_s13, %s3791_s14  ;;  %p3797_p12 = scmp.lt.s32.totalorder %s3791_s14, %s3791_s14 }
 0x1cc   :  { %v3426_v24 = vpop.eup %3425  ;;  %3445 = vrcp.f32 %v977_v21  ;;  %v979_v25 = vadd.f32 1.0, %v3424_v22 }
 0x1cd   :  { %v3428_v27 = vpop.eup %3427  ;;  %3447 = vrcp.f32 %v978_v23  ;;  %v980_v40 = vadd.f32 1.0, %v3426_v24  ;;  %v1989_v13 = vrot.slane %v1984_v12, %v3943_v36  ;;  %p3798_p13 = por %p3797_p12, %p3796_p11 }
 0x1ce   :  { %v3430_v29 = vpop.eup %3429  ;;  %v3022_v30 = vpack.c.bf16 %v3428_v27, %v3418_v14  ;;  %3449 = vrcp.f32 %v979_v25 }
 0x1cf   :  { %v3432_v41 = vpop.eup %3431  ;;  %3451 = vrcp.f32 %v980_v40  ;;  %v1139_v31 = vpack.c.bf16 %v3430_v29, %v3418_v14  ;;  %v1993_v14 = vrot.slane %v1984_v12, %v206_v37  ;;  %v4026_v15 = vrot.slane %v1989_v13, %v3943_v36  ;;  %p3799_p0 = pnand %p3798_p13, %p3792_p10 }
 0x1d0   :  { %v3434_v32 = vpop.eup %3433  ;;  %1331 = vst [vmem:[#allocation10 + $0xc0] sm:$0xff] %v3022_v30  ;;  %v3023_v34 = vpack.c.bf16 %v3432_v41, %v3430_v29  ;;  %3453 = vpow2.f32 %v2836_v26  ;;  %v1140_v35 = vpack.c.bf16 %v3432_v41, %v3428_v27 }
 0x1d1   :  { %v3436_v38 = vpop.eup %3435  ;;  %3455 = vpow2.f32 %v2837_v28  ;;  %v4029_v16 = vrot.slane %v1993_v14, %v3943_v36 }
 0x1d2   :  { %v3438_v39 = vpop.eup %3437  ;;  %1332 = vst [vmem:[#allocation10 + $0xc8] sm:$0xff] %v3023_v34  ;;  %v3024_v42 = vpack.c.bf16 %v3436_v38, %v3434_v32  ;;  %1747 = vmatprep.mubr.bf16.mxu1 %v1140_v35 }
 0x1d3   :  { %v3440_v43 = vpop.eup %3439  ;;  %v981_v44 = vadd.f32 1.0, %v3438_v39  ;;  %1748 = vmatmul.mubr.bf16.gmra.mrb[48].mxu1 %v1139_v31 }
 0x1d4   :  { %v3442_v45 = vpop.eup %3441  ;;  %1333 = vst [vmem:[#allocation10 + $0xd0] sm:$0xff] %v3024_v42  ;;  %v982_v46 = vadd.f32 1.0, %v3440_v43 }
 0x1d5   :  { %v3444_v47 = vpop.eup %3443  ;;  %3457 = vrcp.f32 %v981_v44  ;;  %v983_v48 = vadd.f32 1.0, %v3442_v45 }
 0x1d6   :  { %v3446_v49 = vpop.eup %3445  ;;  %3459 = vrcp.f32 %v982_v46  ;;  %v984_v50 = vadd.f32 1.0, %v3444_v47 }
 0x1d7   :  { %v3448_v51 = vpop.eup %3447  ;;  %3461 = vrcp.f32 %v983_v48  ;;  %v1141_v52 = vpack.c.bf16 %v3446_v49, %v3434_v32 }
 0x1d8   :  { %v3450_v53 = vpop.eup %3449  ;;  %v3025_v54 = vpack.c.bf16 %v3448_v51, %v3446_v49  ;;  %3463 = vrcp.f32 %v984_v50  ;;  %v1142_v55 = vpack.c.bf16 %v3448_v51, %v3436_v38 }
 0x1d9   :  { %v3452_v56 = vpop.eup %3451 }
 0x1da   :  { %v3454_v57 = vpop.eup %3453  ;;  %1334 = vst [vmem:[#allocation10 + $0xd8] sm:$0xff] %v3025_v54  ;;  %v3026_v58 = vpack.c.bf16 %v3452_v56, %v3450_v53  ;;  %1757 = vmatprep.mubr.bf16.mxu1 %v1142_v55 }
 0x1db   :  { %v3456_v59 = vpop.eup %3455  ;;  %v985_v60 = vadd.f32 1.0, %v3454_v57  ;;  %1758 = vmatmul.mubr.bf16.gmra.mrb[52].mxu1 %v1141_v52 }
 0x1dc   :  { %1335 = vst [vmem:[#allocation10 + $0xe0] sm:$0xff] %v3026_v58  ;;  %v986_v61 = vadd.f32 1.0, %v3456_v59 }
 0x1dd   :  { %3465 = vrcp.f32 %v985_v60 }
 0x1de   :  { %3467 = vrcp.f32 %v986_v61 }
 0x1df   :  { %v3458_v62 = vpop.eup %3457 }
 0x1e0   :  { %v3460_v63 = vpop.eup %3459  ;;  %v1143_v0 = vpack.c.bf16 %v3458_v62, %v3450_v53 }
 0x1e1   :  { %v3462_v1 = vpop.eup %3461  ;;  %v3027_v2 = vpack.c.bf16 %v3460_v63, %v3458_v62  ;;  %v1144_v3 = vpack.c.bf16 %v3460_v63, %v3452_v56 }
 0x1e2   :  { %v3464_v4 = vpop.eup %3463 }
 0x1e3   :  { %1336 = vst [vmem:[#allocation10 + $0xe8] sm:$0xff] %v3027_v2  ;;  %v3028_v5 = vpack.c.bf16 %v3464_v4, %v3462_v1  ;;  %1767 = vmatprep.mubr.bf16.mxu1 %v1144_v3 }
 0x1e4   :  { %1768 = vmatmul.mubr.bf16.gmra.mrb[56].mxu1 %v1143_v0 }
 0x1e5   :  { %1337 = vst [vmem:[#allocation10 + $0xf0] sm:$0xff] %v3028_v5 }
 0x1e7   :  { %v3466_v6 = vpop.eup %3465 }
 0x1e8   :  { %v3468_v7 = vpop.eup %3467  ;;  %v1145_v8 = vpack.c.bf16 %v3466_v6, %v3462_v1 }
 0x1e9   :  { %v3029_v9 = vpack.c.bf16 %v3468_v7, %v3466_v6  ;;  %v1146_v10 = vpack.c.bf16 %v3468_v7, %v3464_v4 }
 0x1eb   :  { %1338 = vst [vmem:[#allocation10 + $0xf8] sm:$0xff] %v3029_v9  ;;  %1777 = vmatprep.mubr.bf16.mxu1 %v1146_v10 }
 0x1ec   :  { %1778 = vmatmul.mubr.bf16.gmra.mrb[60].mxu1 %v1145_v8 }
 0x241   :  { %v1629_v17 = vpop.f32.mrb[0].mxu1 }
 0x242   :  { %v2004_v18 = vadd.f32 %v4026_v15, %v1629_v17  ;;  %v1631_v19 = vpop.f32.mrb[1].mxu1 }
 0x243   :  { %v2005_v20 = vadd.f32 %v4029_v16, %v1631_v19  ;;  %v1633_v21 = vpop.f32.mrb[2].mxu1 }
 0x244   :  { %v2902_v22 = vmul.f32 -1.442695, %v2004_v18  ;;  %v2006_v23 = vadd.f32 %v4026_v15, %v1633_v21  ;;  %v1635_v24 = vpop.f32.mrb[3].mxu1 }
 0x245   :  { %v2903_v25 = vmul.f32 -1.442695, %v2005_v20  ;;  %v2007_v33 = vadd.f32 %v4029_v16, %v1635_v24 }
 0x246   :  { %3469 = vpow2.f32 %v2902_v22  ;;  %v2904_v37 = vmul.f32 -1.442695, %v2006_v23 }
 0x247   :  { %3471 = vpow2.f32 %v2903_v25  ;;  %v2905_v26 = vmul.f32 -1.442695, %v2007_v33 }
 0x248   :  { %3473 = vpow2.f32 %v2904_v37 }
 0x249   :  { %3475 = vpow2.f32 %v2905_v26  ;;  %v1639_v36 = vpop.f32.mrb[4].mxu1 }
 0x24a   :  { %v2008_v27 = vadd.f32 %v4026_v15, %v1639_v36  ;;  %v1641_v40 = vpop.f32.mrb[5].mxu1 }
 0x24b   :  { %v2009_v28 = vadd.f32 %v4029_v16, %v1641_v40  ;;  %v1643_v29 = vpop.f32.mrb[6].mxu1 }
 0x24c   :  { %v2906_v30 = vmul.f32 -1.442695, %v2008_v27  ;;  %v2010_v41 = vadd.f32 %v4026_v15, %v1643_v29  ;;  %v1645_v31 = vpop.f32.mrb[7].mxu1 }
 0x24d   :  { %v2907_v32 = vmul.f32 -1.442695, %v2009_v28  ;;  %v2011_v34 = vadd.f32 %v4029_v16, %v1645_v31 }
 0x24e   :  { %3477 = vpow2.f32 %v2906_v30  ;;  %v2908_v35 = vmul.f32 -1.442695, %v2010_v41 }
 0x24f   :  { %3479 = vpow2.f32 %v2907_v32  ;;  %v2909_v38 = vmul.f32 -1.442695, %v2011_v34 }
 0x250   :  { %v3470_v39 = vpop.eup %3469  ;;  %3481 = vpow2.f32 %v2908_v35 }
 0x251   :  { %v3472_v42 = vpop.eup %3471  ;;  %v2260_v43 = vadd.f32 1.0, %v3470_v39  ;;  %3483 = vpow2.f32 %v2909_v38 }
 0x252   :  { %v3474_v44 = vpop.eup %3473  ;;  %v2261_v45 = vadd.f32 1.0, %v3472_v42  ;;  %v1649_v46 = vpop.f32.mrb[8].mxu1 }
 0x253   :  { %v3476_v47 = vpop.eup %3475  ;;  %3485 = vrcp.f32 %v2260_v43  ;;  %v2262_v48 = vadd.f32 1.0, %v3474_v44  ;;  %v2012_v49 = vadd.f32 %v4026_v15, %v1649_v46  ;;  %v1651_v50 = vpop.f32.mrb[9].mxu1 }
 0x254   :  { %3487 = vrcp.f32 %v2261_v45  ;;  %v2263_v51 = vadd.f32 1.0, %v3476_v47  ;;  %v2013_v52 = vadd.f32 %v4029_v16, %v1651_v50  ;;  %v1653_v53 = vpop.f32.mrb[10].mxu1 }
 0x255   :  { %3489 = vrcp.f32 %v2262_v48  ;;  %v2910_v54 = vmul.f32 -1.442695, %v2012_v49  ;;  %v2014_v55 = vadd.f32 %v4026_v15, %v1653_v53  ;;  %v1655_v56 = vpop.f32.mrb[11].mxu1 }
 0x256   :  { %3491 = vrcp.f32 %v2263_v51  ;;  %v2911_v57 = vmul.f32 -1.442695, %v2013_v52  ;;  %v2015_v58 = vadd.f32 %v4029_v16, %v1655_v56 }
 0x257   :  { %3493 = vpow2.f32 %v2910_v54  ;;  %v2912_v59 = vmul.f32 -1.442695, %v2014_v55 }
 0x258   :  { %v3478_v60 = vpop.eup %3477  ;;  %3495 = vpow2.f32 %v2911_v57  ;;  %v2913_v61 = vmul.f32 -1.442695, %v2015_v58 }
 0x259   :  { %v3480_v62 = vpop.eup %3479  ;;  %v2264_v63 = vadd.f32 1.0, %v3478_v60  ;;  %3497 = vpow2.f32 %v2912_v59 }
 0x25a   :  { %v3482_v0 = vpop.eup %3481  ;;  %v2265_v1 = vadd.f32 1.0, %v3480_v62  ;;  %3499 = vpow2.f32 %v2913_v61  ;;  %v1659_v2 = vpop.f32.mrb[12].mxu1 }
 0x25b   :  { %v3484_v3 = vpop.eup %3483  ;;  %3501 = vrcp.f32 %v2264_v63  ;;  %v2266_v4 = vadd.f32 1.0, %v3482_v0  ;;  %v2016_v5 = vadd.f32 %v4026_v15, %v1659_v2  ;;  %v1661_v6 = vpop.f32.mrb[13].mxu1 }
 0x25c   :  { %3503 = vrcp.f32 %v2265_v1  ;;  %v2267_v7 = vadd.f32 1.0, %v3484_v3  ;;  %v2017_v8 = vadd.f32 %v4029_v16, %v1661_v6  ;;  %v1663_v9 = vpop.f32.mrb[14].mxu1 }
 0x25d   :  { %v3486_v10 = vpop.eup %3485  ;;  %3505 = vrcp.f32 %v2266_v4  ;;  %v2914_v11 = vmul.f32 -1.442695, %v2016_v5  ;;  %v2018_v12 = vadd.f32 %v4026_v15, %v1663_v9  ;;  %v1665_v13 = vpop.f32.mrb[15].mxu1 }
 0x25e   :  { %v3488_v14 = vpop.eup %3487  ;;  %3507 = vrcp.f32 %v2267_v7  ;;  %v2915_v17 = vmul.f32 -1.442695, %v2017_v8  ;;  %v2019_v18 = vadd.f32 %v4029_v16, %v1665_v13 }
 0x25f   :  { %v3490_v19 = vpop.eup %3489  ;;  %v3030_v20 = vpack.c.bf16 %v3488_v14, %v3486_v10  ;;  %3509 = vpow2.f32 %v2914_v11  ;;  %v2916_v21 = vmul.f32 -1.442695, %v2018_v12 }
 0x260   :  { %v3492_v22 = vpop.eup %3491  ;;  %3511 = vpow2.f32 %v2915_v17  ;;  %v2917_v23 = vmul.f32 -1.442695, %v2019_v18 }
 0x261   :  { %v3494_v24 = vpop.eup %3493  ;;  %2644 = vst [vmem:[#allocation9] sm:$0xff] %v3030_v20  ;;  %v3031_v25 = vpack.c.bf16 %v3492_v22, %v3490_v19  ;;  %3513 = vpow2.f32 %v2916_v21 }
 0x262   :  { %v3496_v33 = vpop.eup %3495  ;;  %v2268_v37 = vadd.f32 1.0, %v3494_v24  ;;  %3515 = vpow2.f32 %v2917_v23 }
 0x263   :  { %v3498_v26 = vpop.eup %3497  ;;  %2645 = vst [vmem:[#allocation9 + $0x8] sm:$0xff] %v3031_v25  ;;  %v2269_v36 = vadd.f32 1.0, %v3496_v33  ;;  %v1669_v27 = vpop.f32.mrb[16].mxu1 }
 0x264   :  { %v3500_v40 = vpop.eup %3499  ;;  %3517 = vrcp.f32 %v2268_v37  ;;  %v2270_v28 = vadd.f32 1.0, %v3498_v26  ;;  %v2020_v29 = vadd.f32 %v4026_v15, %v1669_v27  ;;  %v1671_v30 = vpop.f32.mrb[17].mxu1 }
 0x265   :  { %3802 = shalt.err (!%p3799_p0)
}
 0x266   :  { %s3803_s17 = scalar_lea.hbm %s4131_s6, 4096 }
 0x267   :  { %p3804_p1 = scmp.ne.s32.totalorder %s4131_s6, %s3803_s17  ;;  %p3807_p2 = scmp.lt.u32.totalorder %s3803_s17, %s4131_s6 }
 0x269   :  { %p3809_p3 = pnand %p3807_p2, %p3804_p1 }
 0x26b   :  { %3812 = shalt.err (!%p3809_p3)
}
 0x26c   :  { %2699 = dma.vmem_to_hbm [thread:$0]  %s2694_s13, 4096, %s4131_s6, [#allocation11], %s3845_s9, %s3845_s9, %s3846_s10   ;;  %v3502_v41 = vpop.eup %3501  ;;  %3519 = vrcp.f32 %v2269_v36  ;;  %v2271_v31 = vadd.f32 1.0, %v3500_v40  ;;  %v2021_v32 = vadd.f32 %v4029_v16, %v1671_v30  ;;  %v1673_v34 = vpop.f32.mrb[18].mxu1  ;;  %v2918_v38 = vmul.f32 -1.442695, %v2020_v29 }
 0x26d   :  { %v3504_v35 = vpop.eup %3503  ;;  %3521 = vrcp.f32 %v2270_v28  ;;  %v2022_v39 = vadd.f32 %v4026_v15, %v1673_v34  ;;  %v1675_v42 = vpop.f32.mrb[19].mxu1  ;;  %s3849_s6 = smov [#allocation9]  }
 0x26e   :  { %v3506_v43 = vpop.eup %3505  ;;  %v3032_v44 = vpack.c.bf16 %v3504_v35, %v3502_v41  ;;  %3523 = vrcp.f32 %v2271_v31  ;;  %v2919_v45 = vmul.f32 -1.442695, %v2021_v32  ;;  %v2023_v46 = vadd.f32 %v4029_v16, %v1675_v42  ;;  %v1679_v56 = vpop.f32.mrb[20].mxu1  ;;  %s2681_s23 = sshll.u32 %s3849_s6, 4  ;;  %s2682_s23 = int_to_ptr.vmem [resolvable:$true] %s2681_s23 }
 0x26f   :  { %v3508_v47 = vpop.eup %3507  ;;  %3525 = vpow2.f32 %v2918_v38  ;;  %v2920_v48 = vmul.f32 -1.442695, %v2022_v39  ;;  %v2024_v59 = vadd.f32 %v4026_v15, %v1679_v56  ;;  %v1681_v60 = vpop.f32.mrb[21].mxu1  ;;  %s3813_s25 = scalar_lea.vmem %s2682_s23, 4096  ;;  %p3818_p5 = scmp.lt.s32.totalorder %s2682_s23, %s2682_s23 }
 0x270   :  { %v3510_v49 = vpop.eup %3509  ;;  %2646 = vst [vmem:[#allocation9 + $0x10] sm:$0xff] %v3032_v44  ;;  %v3033_v50 = vpack.c.bf16 %v3508_v47, %v3506_v43  ;;  %3527 = vpow2.f32 %v2919_v45  ;;  %v2921_v51 = vmul.f32 -1.442695, %v2023_v46  ;;  %v2025_v62 = vadd.f32 %v4029_v16, %v1681_v60  ;;  %v1683_v63 = vpop.f32.mrb[22].mxu1  ;;  %p3814_p4 = scmp.ne.s32.totalorder %s2682_s23, %s3813_s25  ;;  %p3819_p6 = scmp.lt.s32.totalorder %s3813_s25, %s3813_s25 }
 0x271   :  { %v3512_v52 = vpop.eup %3511  ;;  %v2272_v53 = vadd.f32 1.0, %v3510_v49  ;;  %3529 = vpow2.f32 %v2920_v48  ;;  %v2922_v1 = vmul.f32 -1.442695, %v2024_v59  ;;  %v2026_v2 = vadd.f32 %v4026_v15, %v1683_v63  ;;  %v1685_v3 = vpop.f32.mrb[23].mxu1 }
 0x272   :  { %v3514_v54 = vpop.eup %3513  ;;  %2647 = vst [vmem:[#allocation9 + $0x18] sm:$0xff] %v3033_v50  ;;  %v2273_v55 = vadd.f32 1.0, %v3512_v52  ;;  %3531 = vpow2.f32 %v2921_v51  ;;  %v2923_v5 = vmul.f32 -1.442695, %v2025_v62  ;;  %v2027_v6 = vadd.f32 %v4029_v16, %v1685_v3  ;;  %p3820_p7 = por %p3819_p6, %p3818_p5 }
 0x273   :  { %v3516_v57 = vpop.eup %3515  ;;  %3533 = vrcp.f32 %v2272_v53  ;;  %v2274_v58 = vadd.f32 1.0, %v3514_v54  ;;  %v2924_v9 = vmul.f32 -1.442695, %v2026_v2 }
 0x274   :  { %3535 = vrcp.f32 %v2273_v55  ;;  %v2275_v61 = vadd.f32 1.0, %v3516_v57  ;;  %v3518_v0 = vpop.eup %3517  ;;  %v2925_v11 = vmul.f32 -1.442695, %v2027_v6  ;;  %p3821_p8 = pnand %p3820_p7, %p3814_p4 }
 0x275   :  { %3537 = vrcp.f32 %v2274_v58  ;;  %v1689_v22 = vpop.f32.mrb[24].mxu1 }
 0x276   :  { %v3520_v4 = vpop.eup %3519  ;;  %3539 = vrcp.f32 %v2275_v61  ;;  %v2028_v25 = vadd.f32 %v4026_v15, %v1689_v22  ;;  %v1691_v33 = vpop.f32.mrb[25].mxu1 }
 0x277   :  { %v3522_v7 = vpop.eup %3521  ;;  %v3034_v8 = vpack.c.bf16 %v3520_v4, %v3518_v0  ;;  %3541 = vpow2.f32 %v2922_v1  ;;  %v2029_v26 = vadd.f32 %v4029_v16, %v1691_v33  ;;  %v1693_v36 = vpop.f32.mrb[26].mxu1 }
 0x278   :  { %v3524_v10 = vpop.eup %3523  ;;  %3543 = vpow2.f32 %v2923_v5  ;;  %v2926_v28 = vmul.f32 -1.442695, %v2028_v25  ;;  %v2030_v29 = vadd.f32 %v4026_v15, %v1693_v36  ;;  %v1695_v30 = vpop.f32.mrb[27].mxu1 }
 0x279   :  { %v3526_v12 = vpop.eup %3525  ;;  %2648 = vst [vmem:[#allocation9 + $0x20] sm:$0xff] %v3034_v8  ;;  %v3035_v13 = vpack.c.bf16 %v3524_v10, %v3522_v7  ;;  %3545 = vpow2.f32 %v2924_v9  ;;  %v2927_v31 = vmul.f32 -1.442695, %v2029_v26  ;;  %v2031_v32 = vadd.f32 %v4029_v16, %v1695_v30 }
 0x27a   :  { %v3528_v14 = vpop.eup %3527  ;;  %v2276_v17 = vadd.f32 1.0, %v3526_v12  ;;  %3547 = vpow2.f32 %v2925_v11  ;;  %v2928_v38 = vmul.f32 -1.442695, %v2030_v29 }
 0x27b   :  { %v3530_v18 = vpop.eup %3529  ;;  %2649 = vst [vmem:[#allocation9 + $0x28] sm:$0xff] %v3035_v13  ;;  %v2277_v19 = vadd.f32 1.0, %v3528_v14  ;;  %v2929_v47 = vmul.f32 -1.442695, %v2031_v32 }
 0x27c   :  { %v3532_v20 = vpop.eup %3531  ;;  %3549 = vrcp.f32 %v2276_v17  ;;  %v2278_v21 = vadd.f32 1.0, %v3530_v18 }
 0x27d   :  { %v3534_v23 = vpop.eup %3533  ;;  %3551 = vrcp.f32 %v2277_v19  ;;  %v2279_v24 = vadd.f32 1.0, %v3532_v20  ;;  %v1699_v48 = vpop.f32.mrb[28].mxu1 }
 0x27e   :  { %v3536_v37 = vpop.eup %3535  ;;  %3553 = vrcp.f32 %v2278_v21  ;;  %v2032_v50 = vadd.f32 %v4026_v15, %v1699_v48  ;;  %v1701_v51 = vpop.f32.mrb[29].mxu1 }
 0x27f   :  { %v3538_v27 = vpop.eup %3537  ;;  %v3036_v40 = vpack.c.bf16 %v3536_v37, %v3534_v23  ;;  %3555 = vrcp.f32 %v2279_v24  ;;  %v2033_v53 = vadd.f32 %v4029_v16, %v1701_v51  ;;  %v1703_v54 = vpop.f32.mrb[30].mxu1 }
 0x280   :  { %v3540_v41 = vpop.eup %3539  ;;  %3557 = vpow2.f32 %v2926_v28  ;;  %v2930_v56 = vmul.f32 -1.442695, %v2032_v50  ;;  %v2034_v57 = vadd.f32 %v4026_v15, %v1703_v54  ;;  %v1705_v58 = vpop.f32.mrb[31].mxu1 }
 0x281   :  { %v3542_v34 = vpop.eup %3541  ;;  %2650 = vst [vmem:[#allocation9 + $0x30] sm:$0xff] %v3036_v40  ;;  %v3037_v35 = vpack.c.bf16 %v3540_v41, %v3538_v27  ;;  %3559 = vpow2.f32 %v2927_v31  ;;  %v2931_v61 = vmul.f32 -1.442695, %v2033_v53  ;;  %v2035_v62 = vadd.f32 %v4029_v16, %v1705_v58 }
 0x282   :  { %v3544_v39 = vpop.eup %3543  ;;  %v2280_v42 = vadd.f32 1.0, %v3542_v34  ;;  %3561 = vpow2.f32 %v2928_v38  ;;  %v2932_v0 = vmul.f32 -1.442695, %v2034_v57 }
 0x283   :  { %v3546_v43 = vpop.eup %3545  ;;  %2651 = vst [vmem:[#allocation9 + $0x38] sm:$0xff] %v3037_v35  ;;  %v2281_v44 = vadd.f32 1.0, %v3544_v39  ;;  %v2933_v2 = vmul.f32 -1.442695, %v2035_v62 }
 0x284   :  { %v3548_v45 = vpop.eup %3547  ;;  %3563 = vrcp.f32 %v2280_v42  ;;  %v2282_v46 = vadd.f32 1.0, %v3546_v43 }
 0x285   :  { %3565 = vrcp.f32 %v2281_v44  ;;  %v2283_v49 = vadd.f32 1.0, %v3548_v45  ;;  %v1709_v6 = vpop.f32.mrb[32].mxu1 }
 0x286   :  { %v3550_v52 = vpop.eup %3549  ;;  %3567 = vrcp.f32 %v2282_v46  ;;  %v2036_v9 = vadd.f32 %v4026_v15, %v1709_v6  ;;  %v1711_v10 = vpop.f32.mrb[33].mxu1 }
 0x287   :  { %v3552_v55 = vpop.eup %3551  ;;  %3569 = vrcp.f32 %v2283_v49  ;;  %v2037_v13 = vadd.f32 %v4029_v16, %v1711_v10  ;;  %v1713_v14 = vpop.f32.mrb[34].mxu1 }
 0x288   :  { %v3554_v59 = vpop.eup %3553  ;;  %v3038_v60 = vpack.c.bf16 %v3552_v55, %v3550_v52  ;;  %3571 = vpow2.f32 %v2929_v47  ;;  %v2934_v18 = vmul.f32 -1.442695, %v2036_v9  ;;  %v2038_v19 = vadd.f32 %v4026_v15, %v1713_v14  ;;  %v1715_v20 = vpop.f32.mrb[35].mxu1 }
 0x289   :  { %v3556_v63 = vpop.eup %3555  ;;  %3573 = vpow2.f32 %v2930_v56  ;;  %v2935_v23 = vmul.f32 -1.442695, %v2037_v13  ;;  %v2039_v24 = vadd.f32 %v4029_v16, %v1715_v20 }
 0x28a   :  { %2652 = vst [vmem:[#allocation9 + $0x40] sm:$0xff] %v3038_v60  ;;  %v3039_v1 = vpack.c.bf16 %v3556_v63, %v3554_v59  ;;  %3575 = vpow2.f32 %v2931_v61  ;;  %v3558_v3 = vpop.eup %3557  ;;  %v2936_v33 = vmul.f32 -1.442695, %v2038_v19 }
 0x28b   :  { %3577 = vpow2.f32 %v2932_v0  ;;  %v3560_v4 = vpop.eup %3559  ;;  %v2284_v5 = vadd.f32 1.0, %v3558_v3  ;;  %v2937_v36 = vmul.f32 -1.442695, %v2039_v24 }
 0x28c   :  { %2653 = vst [vmem:[#allocation9 + $0x48] sm:$0xff] %v3039_v1  ;;  %3579 = vpow2.f32 %v2933_v2  ;;  %v3562_v7 = vpop.eup %3561  ;;  %v2285_v8 = vadd.f32 1.0, %v3560_v4 }
 0x28d   :  { %3581 = vrcp.f32 %v2284_v5  ;;  %v2286_v12 = vadd.f32 1.0, %v3562_v7  ;;  %v1719_v30 = vpop.f32.mrb[36].mxu1 }
 0x28e   :  { %v3564_v11 = vpop.eup %3563  ;;  %3583 = vrcp.f32 %v2285_v8  ;;  %v2040_v32 = vadd.f32 %v4026_v15, %v1719_v30  ;;  %v1721_v34 = vpop.f32.mrb[37].mxu1 }
 0x28f   :  { %v3566_v17 = vpop.eup %3565  ;;  %3585 = vrcp.f32 %v2286_v12  ;;  %v2041_v39 = vadd.f32 %v4029_v16, %v1721_v34  ;;  %v1723_v42 = vpop.f32.mrb[38].mxu1 }
 0x290   :  { %v3568_v21 = vpop.eup %3567  ;;  %v3040_v22 = vpack.c.bf16 %v3566_v17, %v3564_v11  ;;  %3587 = vpow2.f32 %v2934_v18  ;;  %v2938_v44 = vmul.f32 -1.442695, %v2040_v32  ;;  %v2042_v45 = vadd.f32 %v4026_v15, %v1723_v42  ;;  %v1725_v46 = vpop.f32.mrb[39].mxu1 }
 0x291   :  { %v3570_v25 = vpop.eup %3569  ;;  %3589 = vpow2.f32 %v2935_v23  ;;  %v2939_v48 = vmul.f32 -1.442695, %v2041_v39  ;;  %v2043_v49 = vadd.f32 %v4029_v16, %v1725_v46 }
 0x292   :  { %v3572_v37 = vpop.eup %3571  ;;  %2654 = vst [vmem:[#allocation9 + $0x50] sm:$0xff] %v3040_v22  ;;  %v3041_v26 = vpack.c.bf16 %v3570_v25, %v3568_v21  ;;  %3591 = vpow2.f32 %v2936_v33  ;;  %v2940_v51 = vmul.f32 -1.442695, %v2042_v45 }
 0x293   :  { %v3574_v27 = vpop.eup %3573  ;;  %v2287_v40 = vadd.f32 1.0, %v3572_v37  ;;  %3593 = vpow2.f32 %v2937_v36  ;;  %v2941_v54 = vmul.f32 -1.442695, %v2043_v49 }
 0x294   :  { %v3576_v28 = vpop.eup %3575  ;;  %2655 = vst [vmem:[#allocation9 + $0x58] sm:$0xff] %v3041_v26  ;;  %v2288_v29 = vadd.f32 1.0, %v3574_v27 }
 0x295   :  { %v3578_v41 = vpop.eup %3577  ;;  %3595 = vrcp.f32 %v2287_v40  ;;  %v2289_v31 = vadd.f32 1.0, %v3576_v28  ;;  %v1729_v58 = vpop.f32.mrb[40].mxu1 }
 0x296   :  { %v3580_v35 = vpop.eup %3579  ;;  %3597 = vrcp.f32 %v2288_v29  ;;  %v2290_v38 = vadd.f32 1.0, %v3578_v41  ;;  %v2044_v61 = vadd.f32 %v4026_v15, %v1729_v58  ;;  %v1731_v62 = vpop.f32.mrb[41].mxu1 }
 0x297   :  { %3599 = vrcp.f32 %v2289_v31  ;;  %v2291_v43 = vadd.f32 1.0, %v3580_v35  ;;  %v3582_v47 = vpop.eup %3581  ;;  %v2045_v1 = vadd.f32 %v4029_v16, %v1731_v62  ;;  %v1733_v2 = vpop.f32.mrb[42].mxu1 }
 0x298   :  { %3601 = vrcp.f32 %v2290_v38  ;;  %v3584_v50 = vpop.eup %3583  ;;  %v2942_v5 = vmul.f32 -1.442695, %v2044_v61  ;;  %v2046_v6 = vadd.f32 %v4026_v15, %v1733_v2  ;;  %v1735_v7 = vpop.f32.mrb[43].mxu1 }
 0x299   :  { %3603 = vrcp.f32 %v2291_v43  ;;  %v3586_v52 = vpop.eup %3585  ;;  %v3042_v53 = vpack.c.bf16 %v3584_v50, %v3582_v47  ;;  %v2943_v10 = vmul.f32 -1.442695, %v2045_v1  ;;  %v2047_v11 = vadd.f32 %v4029_v16, %v1735_v7 }
 0x29a   :  { %3605 = vpow2.f32 %v2938_v44  ;;  %v3588_v55 = vpop.eup %3587  ;;  %v2944_v13 = vmul.f32 -1.442695, %v2046_v6 }
 0x29b   :  { %3607 = vpow2.f32 %v2939_v48  ;;  %v3590_v56 = vpop.eup %3589  ;;  %2656 = vst [vmem:[#allocation9 + $0x60] sm:$0xff] %v3042_v53  ;;  %v2292_v57 = vadd.f32 1.0, %v3588_v55  ;;  %v2945_v18 = vmul.f32 -1.442695, %v2047_v11 }
 0x29c   :  { %3609 = vpow2.f32 %v2940_v51  ;;  %v3592_v59 = vpop.eup %3591  ;;  %v2293_v60 = vadd.f32 1.0, %v3590_v56 }
 0x29d   :  { %3611 = vpow2.f32 %v2941_v54  ;;  %v3594_v63 = vpop.eup %3593  ;;  %v2294_v0 = vadd.f32 1.0, %v3592_v59 }
 0x29e   :  { %3613 = vrcp.f32 %v2292_v57  ;;  %v2295_v4 = vadd.f32 1.0, %v3594_v63  ;;  %v1739_v24 = vpop.f32.mrb[44].mxu1 }
 0x29f   :  { %v3596_v3 = vpop.eup %3595  ;;  %3615 = vrcp.f32 %v2293_v60  ;;  %v2048_v37 = vadd.f32 %v4026_v15, %v1739_v24  ;;  %v1741_v26 = vpop.f32.mrb[45].mxu1 }
 0x2a0   :  { %v3598_v8 = vpop.eup %3597  ;;  %v3043_v9 = vpack.c.bf16 %v3596_v3, %v3586_v52  ;;  %3617 = vrcp.f32 %v2294_v0  ;;  %v2049_v40 = vadd.f32 %v4029_v16, %v1741_v26  ;;  %v1743_v28 = vpop.f32.mrb[46].mxu1 }
 0x2a1   :  { %v3600_v12 = vpop.eup %3599  ;;  %3619 = vrcp.f32 %v2295_v4  ;;  %v2946_v41 = vmul.f32 -1.442695, %v2048_v37  ;;  %v2050_v31 = vadd.f32 %v4026_v15, %v1743_v28  ;;  %v1745_v32 = vpop.f32.mrb[47].mxu1 }
 0x2a2   :  { %v3602_v14 = vpop.eup %3601  ;;  %2657 = vst [vmem:[#allocation9 + $0x68] sm:$0xff] %v3043_v9  ;;  %v3044_v17 = vpack.c.bf16 %v3600_v12, %v3598_v8  ;;  %3621 = vpow2.f32 %v2942_v5  ;;  %v2947_v35 = vmul.f32 -1.442695, %v2049_v40  ;;  %v2051_v38 = vadd.f32 %v4029_v16, %v1745_v32 }
 0x2a3   :  { %v3604_v19 = vpop.eup %3603  ;;  %3623 = vpow2.f32 %v2943_v10  ;;  %v2948_v43 = vmul.f32 -1.442695, %v2050_v31 }
 0x2a4   :  { %v3606_v20 = vpop.eup %3605  ;;  %2658 = vst [vmem:[#allocation9 + $0x70] sm:$0xff] %v3044_v17  ;;  %v3045_v21 = vpack.c.bf16 %v3604_v19, %v3602_v14  ;;  %3625 = vpow2.f32 %v2944_v13  ;;  %v2949_v45 = vmul.f32 -1.442695, %v2051_v38 }
 0x2a5   :  { %v3608_v22 = vpop.eup %3607  ;;  %v2296_v23 = vadd.f32 1.0, %v3606_v20  ;;  %3627 = vpow2.f32 %v2945_v18 }
 0x2a6   :  { %v3610_v25 = vpop.eup %3609  ;;  %2659 = vst [vmem:[#allocation9 + $0x78] sm:$0xff] %v3045_v21  ;;  %v2297_v33 = vadd.f32 1.0, %v3608_v22  ;;  %v1749_v50 = vpop.f32.mrb[48].mxu1 }
 0x2a7   :  { %v3612_v36 = vpop.eup %3611  ;;  %3629 = vrcp.f32 %v2296_v23  ;;  %v2298_v27 = vadd.f32 1.0, %v3610_v25  ;;  %v2052_v53 = vadd.f32 %v4026_v15, %v1749_v50  ;;  %v1751_v54 = vpop.f32.mrb[49].mxu1 }
 0x2a8   :  { %v3614_v29 = vpop.eup %3613  ;;  %3631 = vrcp.f32 %v2297_v33  ;;  %v2299_v30 = vadd.f32 1.0, %v3612_v36  ;;  %v2053_v57 = vadd.f32 %v4029_v16, %v1751_v54  ;;  %v1753_v58 = vpop.f32.mrb[50].mxu1 }
 0x2a9   :  { %v3616_v34 = vpop.eup %3615  ;;  %3633 = vrcp.f32 %v2298_v27  ;;  %v2950_v60 = vmul.f32 -1.442695, %v2052_v53  ;;  %v2054_v61 = vadd.f32 %v4026_v15, %v1753_v58  ;;  %v1755_v62 = vpop.f32.mrb[51].mxu1 }
 0x2aa   :  { %v3618_v39 = vpop.eup %3617  ;;  %v3046_v42 = vpack.c.bf16 %v3616_v34, %v3614_v29  ;;  %3635 = vrcp.f32 %v2299_v30  ;;  %v2951_v0 = vmul.f32 -1.442695, %v2053_v57  ;;  %v2055_v1 = vadd.f32 %v4029_v16, %v1755_v62 }
 0x2ab   :  { %v3620_v44 = vpop.eup %3619  ;;  %3637 = vpow2.f32 %v2946_v41  ;;  %v2952_v3 = vmul.f32 -1.442695, %v2054_v61 }
 0x2ac   :  { %v3622_v46 = vpop.eup %3621  ;;  %2660 = vst [vmem:[#allocation9 + $0x80] sm:$0xff] %v3046_v42  ;;  %v3047_v47 = vpack.c.bf16 %v3620_v44, %v3618_v39  ;;  %3639 = vpow2.f32 %v2947_v35  ;;  %v2953_v6 = vmul.f32 -1.442695, %v2055_v1 }
 0x2ad   :  { %v3624_v48 = vpop.eup %3623  ;;  %v2300_v49 = vadd.f32 1.0, %v3622_v46  ;;  %3641 = vpow2.f32 %v2948_v43 }
 0x2ae   :  { %v3626_v51 = vpop.eup %3625  ;;  %2661 = vst [vmem:[#allocation9 + $0x88] sm:$0xff] %v3047_v47  ;;  %v2301_v52 = vadd.f32 1.0, %v3624_v48  ;;  %3643 = vpow2.f32 %v2949_v45  ;;  %v1759_v10 = vpop.f32.mrb[52].mxu1 }
 0x2af   :  { %v3628_v55 = vpop.eup %3627  ;;  %3645 = vrcp.f32 %v2300_v49  ;;  %v2302_v56 = vadd.f32 1.0, %v3626_v51  ;;  %v2056_v13 = vadd.f32 %v4026_v15, %v1759_v10  ;;  %v1761_v14 = vpop.f32.mrb[53].mxu1 }
 0x2b0   :  { %3647 = vrcp.f32 %v2301_v52  ;;  %v2303_v59 = vadd.f32 1.0, %v3628_v55  ;;  %v2057_v19 = vadd.f32 %v4029_v16, %v1761_v14  ;;  %v1763_v20 = vpop.f32.mrb[54].mxu1 }
 0x2b1   :  { %v3630_v63 = vpop.eup %3629  ;;  %3649 = vrcp.f32 %v2302_v56  ;;  %v2954_v23 = vmul.f32 -1.442695, %v2056_v13  ;;  %v2058_v24 = vadd.f32 %v4026_v15, %v1763_v20  ;;  %v1765_v25 = vpop.f32.mrb[55].mxu1 }
 0x2b2   :  { %v3632_v2 = vpop.eup %3631  ;;  %3651 = vrcp.f32 %v2303_v59  ;;  %v2955_v26 = vmul.f32 -1.442695, %v2057_v19  ;;  %v2059_v36 = vadd.f32 %v4029_v16, %v1765_v25 }
 0x2b3   :  { %v3634_v4 = vpop.eup %3633  ;;  %v3048_v5 = vpack.c.bf16 %v3632_v2, %v3630_v63  ;;  %3653 = vpow2.f32 %v2950_v60  ;;  %v2956_v40 = vmul.f32 -1.442695, %v2058_v24 }
 0x2b4   :  { %v3636_v7 = vpop.eup %3635  ;;  %3655 = vpow2.f32 %v2951_v0  ;;  %v2957_v30 = vmul.f32 -1.442695, %v2059_v36 }
 0x2b5   :  { %v3638_v8 = vpop.eup %3637  ;;  %2662 = vst [vmem:[#allocation9 + $0x90] sm:$0xff] %v3048_v5  ;;  %v3049_v9 = vpack.c.bf16 %v3636_v7, %v3634_v4  ;;  %3657 = vpow2.f32 %v2952_v3 }
 0x2b6   :  { %v3640_v11 = vpop.eup %3639  ;;  %v2304_v12 = vadd.f32 1.0, %v3638_v8  ;;  %3659 = vpow2.f32 %v2953_v6 }
 0x2b7   :  { %v3642_v17 = vpop.eup %3641  ;;  %2663 = vst [vmem:[#allocation9 + $0x98] sm:$0xff] %v3049_v9  ;;  %v2305_v18 = vadd.f32 1.0, %v3640_v11  ;;  %v1769_v38 = vpop.f32.mrb[56].mxu1 }
 0x2b8   :  { %v3644_v21 = vpop.eup %3643  ;;  %3661 = vrcp.f32 %v2304_v12  ;;  %v2306_v22 = vadd.f32 1.0, %v3642_v17  ;;  %v2060_v43 = vadd.f32 %v4026_v15, %v1769_v38  ;;  %v1771_v44 = vpop.f32.mrb[57].mxu1 }
 0x2b9   :  { %v3646_v33 = vpop.eup %3645  ;;  %3663 = vrcp.f32 %v2305_v18  ;;  %v2307_v37 = vadd.f32 1.0, %v3644_v21  ;;  %v2061_v47 = vadd.f32 %v4029_v16, %v1771_v44  ;;  %v1773_v48 = vpop.f32.mrb[58].mxu1 }
 0x2ba   :  { %v3648_v27 = vpop.eup %3647  ;;  %3665 = vrcp.f32 %v2306_v22  ;;  %v2958_v50 = vmul.f32 -1.442695, %v2060_v43  ;;  %v2062_v51 = vadd.f32 %v4026_v15, %v1773_v48  ;;  %v1775_v52 = vpop.f32.mrb[59].mxu1 }
 0x2bb   :  { %v3650_v28 = vpop.eup %3649  ;;  %v3050_v29 = vpack.c.bf16 %v3648_v27, %v3646_v33  ;;  %3667 = vrcp.f32 %v2307_v37  ;;  %v2959_v54 = vmul.f32 -1.442695, %v2061_v47  ;;  %v2063_v55 = vadd.f32 %v4029_v16, %v1775_v52 }
 0x2bc   :  { %v3652_v41 = vpop.eup %3651  ;;  %3669 = vpow2.f32 %v2954_v23  ;;  %v2960_v57 = vmul.f32 -1.442695, %v2062_v51 }
 0x2bd   :  { %v3654_v31 = vpop.eup %3653  ;;  %2664 = vst [vmem:[#allocation9 + $0xa0] sm:$0xff] %v3050_v29  ;;  %v3051_v32 = vpack.c.bf16 %v3652_v41, %v3650_v28  ;;  %3671 = vpow2.f32 %v2955_v26  ;;  %v2961_v60 = vmul.f32 -1.442695, %v2063_v55 }
 0x2be   :  { %v3656_v34 = vpop.eup %3655  ;;  %v2308_v35 = vadd.f32 1.0, %v3654_v31  ;;  %3673 = vpow2.f32 %v2956_v40 }
 0x2bf   :  { %v3658_v39 = vpop.eup %3657  ;;  %2665 = vst [vmem:[#allocation9 + $0xa8] sm:$0xff] %v3051_v32  ;;  %v2309_v42 = vadd.f32 1.0, %v3656_v34  ;;  %3675 = vpow2.f32 %v2957_v30  ;;  %v1779_v0 = vpop.f32.mrb[60].mxu1 }
 0x2c0   :  { %v3660_v45 = vpop.eup %3659  ;;  %3677 = vrcp.f32 %v2308_v35  ;;  %v2310_v46 = vadd.f32 1.0, %v3658_v39  ;;  %v2064_v3 = vadd.f32 %v4026_v15, %v1779_v0  ;;  %v1781_v4 = vpop.f32.mrb[61].mxu1 }
 0x2c1   :  { %3679 = vrcp.f32 %v2309_v42  ;;  %v2311_v49 = vadd.f32 1.0, %v3660_v45  ;;  %v2065_v7 = vadd.f32 %v4029_v16, %v1781_v4  ;;  %v1783_v8 = vpop.f32.mrb[62].mxu1 }
 0x2c2   :  { %v3662_v53 = vpop.eup %3661  ;;  %3681 = vrcp.f32 %v2310_v46  ;;  %v2962_v11 = vmul.f32 -1.442695, %v2064_v3  ;;  %v2066_v12 = vadd.f32 %v4026_v15, %v1783_v8  ;;  %v1785_v13 = vpop.f32.mrb[63].mxu1 }
 0x2c3   :  { %v3664_v56 = vpop.eup %3663  ;;  %3683 = vrcp.f32 %v2311_v49  ;;  %v2963_v18 = vmul.f32 -1.442695, %v2065_v7  ;;  %v2067_v19 = vadd.f32 %v4029_v16, %v1785_v13 }
 0x2c4   :  { %v3666_v58 = vpop.eup %3665  ;;  %v3052_v59 = vpack.c.bf16 %v3664_v56, %v3662_v53  ;;  %3685 = vpow2.f32 %v2958_v50  ;;  %v2964_v21 = vmul.f32 -1.442695, %v2066_v12 }
 0x2c5   :  { %v3668_v61 = vpop.eup %3667  ;;  %3687 = vpow2.f32 %v2959_v54  ;;  %v2965_v24 = vmul.f32 -1.442695, %v2067_v19 }
 0x2c6   :  { %v3670_v62 = vpop.eup %3669  ;;  %2666 = vst [vmem:[#allocation9 + $0xb0] sm:$0xff] %v3052_v59  ;;  %v3053_v63 = vpack.c.bf16 %v3668_v61, %v3666_v58  ;;  %3689 = vpow2.f32 %v2960_v57 }
 0x2c7   :  { %v3672_v1 = vpop.eup %3671  ;;  %v2312_v2 = vadd.f32 1.0, %v3670_v62  ;;  %3691 = vpow2.f32 %v2961_v60 }
 0x2c8   :  { %v3674_v5 = vpop.eup %3673  ;;  %2667 = vst [vmem:[#allocation9 + $0xb8] sm:$0xff] %v3053_v63  ;;  %v2313_v6 = vadd.f32 1.0, %v3672_v1 }
 0x2c9   :  { %v3676_v9 = vpop.eup %3675  ;;  %3693 = vrcp.f32 %v2312_v2  ;;  %v2314_v10 = vadd.f32 1.0, %v3674_v5 }
 0x2ca   :  { %v3678_v14 = vpop.eup %3677  ;;  %3695 = vrcp.f32 %v2313_v6  ;;  %v2315_v17 = vadd.f32 1.0, %v3676_v9 }
 0x2cb   :  { %v3680_v20 = vpop.eup %3679  ;;  %3697 = vrcp.f32 %v2314_v10 }
 0x2cc   :  { %v3682_v22 = vpop.eup %3681  ;;  %v3054_v23 = vpack.c.bf16 %v3680_v20, %v3678_v14  ;;  %3699 = vrcp.f32 %v2315_v17 }
 0x2cd   :  { %v3684_v25 = vpop.eup %3683  ;;  %3701 = vpow2.f32 %v2962_v11 }
 0x2ce   :  { %v3686_v33 = vpop.eup %3685  ;;  %2668 = vst [vmem:[#allocation9 + $0xc0] sm:$0xff] %v3054_v23  ;;  %v3055_v37 = vpack.c.bf16 %v3684_v25, %v3682_v22  ;;  %3703 = vpow2.f32 %v2963_v18 }
 0x2cf   :  { %v3688_v15 = vpop.eup %3687  ;;  %v2316_v26 = vadd.f32 1.0, %v3686_v33  ;;  %3705 = vpow2.f32 %v2964_v21 }
 0x2d0   :  { %v3690_v36 = vpop.eup %3689  ;;  %2669 = vst [vmem:[#allocation9 + $0xc8] sm:$0xff] %v3055_v37  ;;  %v2317_v27 = vadd.f32 1.0, %v3688_v15  ;;  %3707 = vpow2.f32 %v2965_v24 }
 0x2d1   :  { %v3692_v16 = vpop.eup %3691  ;;  %3709 = vrcp.f32 %v2316_v26  ;;  %v2318_v40 = vadd.f32 1.0, %v3690_v36 }
 0x2d2   :  { %3711 = vrcp.f32 %v2317_v27  ;;  %v2319_v28 = vadd.f32 1.0, %v3692_v16 }
 0x2d3   :  { %v3694_v29 = vpop.eup %3693  ;;  %3713 = vrcp.f32 %v2318_v40 }
 0x2d4   :  { %v3696_v30 = vpop.eup %3695  ;;  %3715 = vrcp.f32 %v2319_v28 }
 0x2d5   :  { %v3698_v41 = vpop.eup %3697  ;;  %v3056_v31 = vpack.c.bf16 %v3696_v30, %v3694_v29 }
 0x2d6   :  { %v3700_v32 = vpop.eup %3699 }
 0x2d7   :  { %v3702_v34 = vpop.eup %3701  ;;  %2670 = vst [vmem:[#allocation9 + $0xd0] sm:$0xff] %v3056_v31  ;;  %v3057_v35 = vpack.c.bf16 %v3700_v32, %v3698_v41 }
 0x2d8   :  { %v3704_v38 = vpop.eup %3703  ;;  %v2320_v39 = vadd.f32 1.0, %v3702_v34 }
 0x2d9   :  { %v3706_v42 = vpop.eup %3705  ;;  %2671 = vst [vmem:[#allocation9 + $0xd8] sm:$0xff] %v3057_v35  ;;  %v2321_v43 = vadd.f32 1.0, %v3704_v38 }
 0x2da   :  { %v3708_v44 = vpop.eup %3707  ;;  %3717 = vrcp.f32 %v2320_v39  ;;  %v2322_v45 = vadd.f32 1.0, %v3706_v42 }
 0x2db   :  { %v3710_v46 = vpop.eup %3709  ;;  %3719 = vrcp.f32 %v2321_v43  ;;  %v2323_v47 = vadd.f32 1.0, %v3708_v44 }
 0x2dc   :  { %v3712_v48 = vpop.eup %3711  ;;  %3721 = vrcp.f32 %v2322_v45 }
 0x2dd   :  { %v3714_v49 = vpop.eup %3713  ;;  %v3058_v50 = vpack.c.bf16 %v3712_v48, %v3710_v46  ;;  %3723 = vrcp.f32 %v2323_v47 }
 0x2de   :  { %v3716_v51 = vpop.eup %3715 }
 0x2df   :  { %2672 = vst [vmem:[#allocation9 + $0xe0] sm:$0xff] %v3058_v50  ;;  %v3059_v52 = vpack.c.bf16 %v3716_v51, %v3714_v49 }
 0x2e1   :  { %2673 = vst [vmem:[#allocation9 + $0xe8] sm:$0xff] %v3059_v52 }
 0x2e4   :  { %v3718_v53 = vpop.eup %3717 }
 0x2e5   :  { %v3720_v54 = vpop.eup %3719 }
 0x2e6   :  { %v3722_v55 = vpop.eup %3721  ;;  %v3060_v56 = vpack.c.bf16 %v3720_v54, %v3718_v53 }
 0x2e7   :  { %v3724_v57 = vpop.eup %3723 }
 0x2e8   :  { %2674 = vst [vmem:[#allocation9 + $0xf0] sm:$0xff] %v3060_v56  ;;  %v3061_v58 = vpack.c.bf16 %v3724_v57, %v3722_v55 }
 0x2ea   :  { %2675 = vst [vmem:[#allocation9 + $0xf8] sm:$0xff] %v3061_v58 }
 0x2eb   :  { %3824 = shalt.err (!%p3821_p8)
}
 0x2ec   :  { %s3825_s28 = scalar_lea.hbm %s4130_s5, 4096 }
 0x2ed   :  { %p3826_p9 = scmp.ne.s32.totalorder %s4130_s5, %s3825_s28  ;;  %p3829_p10 = scmp.lt.u32.totalorder %s3825_s28, %s4130_s5 }
 0x2ef   :  { %p3831_p11 = pnand %p3829_p10, %p3826_p9 }
 0x2f1   :  { %3834 = shalt.err (!%p3831_p11)
}
 0x2f2   :  { %2687 = dma.vmem_to_hbm [thread:$0]  %s2682_s23, 4096, %s4130_s5, [#allocation5], %s3845_s9, %s3845_s9, %s3846_s10  }
 0x2f3   :  { %3839 = dma.done.wait [#allocation5], 4096  }
 0x2f4   :  { %3840 = vsyncadd [#allocation5], 4294963200 }
 0x2f5   :  { %3841 = dma.done.wait [#allocation11], 4096  }
 0x2f6   :  { %3842 = vsyncadd [#allocation11], 4294963200 }
 0x2f7   :  { %2706 = vsyncpa [#allocation4], 1 }
 0x2f8   :  { %2707 = vsyncpa [#allocation7], 1 }
 0x2f9   :  { %2708 = vsyncpa [#allocation5], 1 }
 0x2fa   :  { %2709 = vsyncpa [#allocation11], 1 }

</bundles_post_ra>
